<compile_context>
chip_gen: v6e
topology: v6e:2x2x1
jax: 0.10.0
libtpu: 0.0.40
codegen_flags: <defaults>
</compile_context>

<pallas_src>
import functools
import math

import jax
import jax.numpy as jnp
from jax import lax
from jax.experimental import pallas as pl
from jax.experimental.pallas import tpu as pltpu


def _round_up(x, m):
    return ((x + m - 1) // m) * m


def _pick_tile(p, max_tile=512):
    """Largest multiple-of-128 divisor of p that is <= max_tile (else p itself)."""
    for t in range(max_tile, 127, -128):
        if t <= p and p % t == 0:
            return t
    return p


# ------------------------------ fused kernel --------------------------------

def _fused_sasa_kernel(x_ref, w_ref, rel_ref, mask_ref, o_ref,
                       kpad_ref, vpad_ref, *,
                       shifts, tile_p, n_tiles_p, halo, p_total,
                       matmul_dtype, precision):
    # x_ref    : (1, C, P)         full flat image for this batch element
    # w_ref    : (3, 1, GC, C)     q / k / v weights for this group
    # rel_ref  : (KK, GC)          relative-position table
    # mask_ref : (KK, TP)          1.0 where the neighbour is a real pixel
    # o_ref    : (1, 1, GC, TP)
    # kpad_ref : (GC, P + 2*HALO)  VMEM scratch: zero-haloed k row (per batch, group)
    # vpad_ref : (GC, P + 2*HALO)  VMEM scratch: zero-haloed v row
    t = pl.program_id(2)
    gc = kpad_ref.shape[0]

    # ---- k|v projection for the whole image, once per (batch, group) ----
    @pl.when(t == 0)
    def _project_kv():
        xd = x_ref[0].astype(matmul_dtype)                             # (C, P)
        k_full = jnp.dot(w_ref[1, 0].astype(matmul_dtype), xd,
                         precision=precision,
                         preferred_element_type=jnp.float32)           # (GC, P)
        v_full = jnp.dot(w_ref[2, 0].astype(matmul_dtype), xd,
                         precision=precision,
                         preferred_element_type=jnp.float32)           # (GC, P)
        if halo > 0:  # lane-aligned halos (HALO is a multiple of 128)
            zeros = jnp.zeros((gc, halo), jnp.float32)
            kpad_ref[:, :halo] = zeros
            kpad_ref[:, halo + p_total:] = zeros
            vpad_ref[:, :halo] = zeros
            vpad_ref[:, halo + p_total:] = zeros
        kpad_ref[:, halo:halo + p_total] = k_full
        vpad_ref[:, halo:halo + p_total] = v_full

    # ---- q projection for this pixel tile only ----
    if n_tiles_p > 1:
        base = pl.multiple_of(t * tile_p, tile_p)
        x_t = x_ref[0, :, pl.ds(base, tile_p)]
    else:
        base = 0                                  # static path: no dynamic offsets
        x_t = x_ref[0]
    q = jnp.dot(w_ref[0, 0].astype(matmul_dtype), x_t.astype(matmul_dtype),
                precision=precision,
                preferred_element_type=jnp.float32)                    # (GC, TP)

    rel = rel_ref[...]                                                 # (KK, GC)
    mask = mask_ref[...]                                               # (KK, TP)

    # Position term on the MXU: pos[j, p] = q[:, p] . rel[j, :]
    pos = jnp.dot(rel.astype(matmul_dtype), q.astype(matmul_dtype),
                  precision=precision,
                  preferred_element_type=jnp.float32)                  # (KK, TP)

    # Fused unfold: each neighbour j is a lane slice of the haloed scratch + mask.
    logit_rows = []
    v_rows = []
    for j, off in enumerate(shifts):
        start = off if n_tiles_p == 1 else base + off
        mj = mask[j:j + 1, :]                                          # (1, TP)
        kj = kpad_ref[:, pl.ds(start, tile_p)] * mj                    # (GC, TP), 0 at pad
        vj = vpad_ref[:, pl.ds(start, tile_p)] * mj
        content = jnp.sum(q * kj, axis=0, keepdims=True)               # (1, TP)
        logit_rows.append(content + pos[j:j + 1, :])                   # q.(k+rel), k=0 at pad
        v_rows.append(vj)

    # Softmax over the KK neighbours, fully unrolled (KK is small, static).
    m = logit_rows[0]
    for lr in logit_rows[1:]:
        m = jnp.maximum(m, lr)
    e_rows = [jnp.exp(lr - m) for lr in logit_rows]
    den = e_rows[0]
    for er in e_rows[1:]:
        den = den + er
    inv = pl.reciprocal(den, approx=False)                             # (1, TP)

    # KK-unrolled output accumulation: dense VPU FMAs, no (P,KK,GC) temporary.
    acc = (e_rows[0] * inv) * v_rows[0]                                # (GC, TP)
    for j in range(1, len(shifts)):
        acc = acc + (e_rows[j] * inv) * v_rows[j]
    o_ref[0, 0] = acc.astype(o_ref.dtype)


# --------------------------------- forward ----------------------------------

def self_attention_2d_pallas(x, w_qkv, rel_h, rel_w, *, out_channels, kernel_size,
                             padding, groups, stride=1, matmul_dtype=jnp.float32):
    """Forward of SelfAttention2d. x is NCHW (like PyTorch)."""
    N, C, H, W = x.shape
    OC, K, G = out_channels, kernel_size, groups
    GC = OC // G
    KK = K * K
    P = H * W
    S = padding * (W + 1)              # flat halo needed on each side of the pixel axis
    HALO = _round_up(S, 128)           # lane-aligned halo -> aligned scratch stores
    Ppad = P + 2 * HALO

    use_f32 = jnp.dtype(matmul_dtype) == jnp.dtype(jnp.float32)
    precision = lax.Precision.HIGHEST if use_f32 else None

    # channel-major, pixels lane-dense
    x_ncp = x.reshape(N, C, P).astype(jnp.float32)                     # (N, C, P)
    w = w_qkv.reshape(3, G, GC, C).astype(jnp.float32)                 # (3, G, GC, C)

    # --- relative-position table, shared across groups: (KK, GC) ---
    rh = rel_h.reshape(GC // 2, K).astype(jnp.float32)                 # (c, dy)
    rw = rel_w.reshape(GC // 2, K).astype(jnp.float32)                 # (c, dx)
    rel_h_full = jnp.broadcast_to(rh[:, :, None], (GC // 2, K, K)).reshape(GC // 2, KK)
    rel_w_full = jnp.broadcast_to(rw[:, None, :], (GC // 2, K, K)).reshape(GC // 2, KK)
    rel = jnp.concatenate([rel_h_full, rel_w_full], axis=0).T          # (KK, GC)

    # --- neighbour validity masks (KK, P) and flat lane-shift offsets ---
    ys = jnp.arange(H)[:, None]
    xs = jnp.arange(W)[None, :]
    mask_rows, shifts = [], []
    for dy in range(K):
        for dx in range(K):
            yy = ys + dy - padding
            xw = xs + dx - padding
            valid = (yy >= 0) & (yy < H) & (xw >= 0) & (xw < W)
            mask_rows.append(valid.reshape(P))
            shifts.append(HALO + (dy - padding) * W + (dx - padding))
    mask = jnp.stack(mask_rows, axis=0).astype(jnp.float32)            # (KK, P)

    tile_p = _pick_tile(P)
    n_tiles_p = P // tile_p
    kernel = functools.partial(
        _fused_sasa_kernel, shifts=tuple(shifts), tile_p=tile_p,
        n_tiles_p=n_tiles_p, halo=HALO, p_total=P,
        matmul_dtype=matmul_dtype, precision=precision)

    out_g = pl.pallas_call(
        kernel,
        out_shape=jax.ShapeDtypeStruct((N, G, GC, P), jnp.float32),
        grid=(N, G, n_tiles_p),
        in_specs=[
            pl.BlockSpec((1, C, P), lambda n, g, t: (n, 0, 0)),         # x (full image row)
            pl.BlockSpec((3, 1, GC, C), lambda n, g, t: (0, g, 0, 0)),  # q/k/v weights, group g
            pl.BlockSpec((KK, GC), lambda n, g, t: (0, 0)),             # rel table
            pl.BlockSpec((KK, tile_p), lambda n, g, t: (0, t)),         # validity mask
        ],
        out_specs=pl.BlockSpec((1, 1, GC, tile_p), lambda n, g, t: (n, g, 0, t)),
        scratch_shapes=[pltpu.VMEM((GC, Ppad), jnp.float32),            # haloed k row
                        pltpu.VMEM((GC, Ppad), jnp.float32)],           # haloed v row
        compiler_params=pltpu.CompilerParams(
            dimension_semantics=("parallel", "parallel", "arbitrary"),
            vmem_limit_bytes=64 * 1024 * 1024),
    )(x_ncp, w, rel, mask)

    out = out_g.reshape(N, OC, H, W)
    if stride > 1:
        # AvgPool2d(stride, stride) for H, W divisible by stride (plain-JAX glue).
        out = out.reshape(N, OC, H // stride, stride, W // stride, stride).mean(axis=(3, 5))
    return out


# --------------------------- pure-JAX reference ------------------------------

def reference_forward(x, w_qkv, rel_h, rel_w, *,
                      out_channels, kernel_size, padding, groups, stride=1):
    N, C, H, W = x.shape
    OC, K, G = out_channels, kernel_size, groups
    GC = OC // G
    qkv = jnp.einsum('nchw,oc->nohw', x, w_qkv.reshape(3 * OC, C),
                     precision=jax.lax.Precision.HIGHEST)
    q, kv = qkv[:, :OC], qkv[:, OC:]
    kvp = jnp.pad(kv, ((0, 0), (0, 0), (padding, padding), (padding, padding)))
    rows = []
    for dy in range(K):
        cols = []
        for dx in range(K):
            cols.append(kvp[:, :, dy:dy + H, dx:dx + W])
        rows.append(jnp.stack(cols, axis=-1))
    unf = jnp.stack(rows, axis=-2)                         # (N,2OC,H,W,K,K)
    k_, v_ = unf[:, :OC], unf[:, OC:]
    k_ = k_.reshape(N, G, GC, H, W, K, K)
    kh, kw = k_[:, :, :GC // 2], k_[:, :, GC // 2:]
    kr = jnp.concatenate([kh + rel_h, kw + rel_w], axis=2)
    q_ = q.reshape(N, G, GC, H, W, 1)
    kr = kr.reshape(N, G, GC, H, W, K * K)
    v_ = v_.reshape(N, G, GC, H, W, K * K)
    qkr = jnp.sum(q_ * kr, axis=2)
    qkr = jax.nn.softmax(qkr, axis=-1)[:, :, None]
    out = jnp.sum(qkr * v_, axis=-1).reshape(N, OC, H, W)
    if stride > 1:
        out = out.reshape(N, OC, H // stride, stride, W // stride, stride).mean(axis=(3, 5))
    return out


# ---------------------------------- main -------------------------------------

if __name__ == "__main__":
    N, C = 2, 4
    H = W = 16
    OUT_CHANNELS = 8
    KERNEL_SIZE = 3
    PADDING = 1          # must satisfy 2*padding = kernel_size - 1
    GROUPS = 2
    STRIDE = 1
    GC = OUT_CHANNELS // GROUPS

    key = jax.random.PRNGKey(0)
    k1, k2, k3, k4 = jax.random.split(key, 4)

    w_qkv = jax.random.normal(k1, (3 * OUT_CHANNELS, C, 1, 1), jnp.float32) * math.sqrt(1.0 / C)
    rel_h = jax.random.normal(k2, (GC // 2, 1, 1, KERNEL_SIZE, 1), jnp.float32) * math.sqrt(1.0 / GC)
    rel_w = jax.random.normal(k3, (GC // 2, 1, 1, 1, KERNEL_SIZE), jnp.float32) * math.sqrt(1.0 / GC)
    x = jax.random.normal(k4, (N, C, H, W), jnp.float32)

    # Exact f32 path (matches the f32 PyTorch module).
    out = self_attention_2d_pallas(
        x, w_qkv, rel_h, rel_w,
        out_channels=OUT_CHANNELS, kernel_size=KERNEL_SIZE,
        padding=PADDING, groups=GROUPS, stride=STRIDE,
        matmul_dtype=jnp.float32)
    out = jax.block_until_ready(out)

    ref = reference_forward(
        x, w_qkv, rel_h, rel_w,
        out_channels=OUT_CHANNELS, kernel_size=KERNEL_SIZE,
        padding=PADDING, groups=GROUPS, stride=STRIDE)
    ref = jax.block_until_ready(ref)

    assert out.shape == (N, OUT_CHANNELS, H // STRIDE, W // STRIDE)
    assert jnp.allclose(out, ref, atol=1e-3, rtol=1e-3), \
        f"max abs err {jnp.max(jnp.abs(out - ref))}"

    # bf16-operand MXU path (v6e/v7x throughput, f32 accumulation): smoke test.
    out_bf16 = self_attention_2d_pallas(
        x, w_qkv, rel_h, rel_w,
        out_channels=OUT_CHANNELS, kernel_size=KERNEL_SIZE,
        padding=PADDING, groups=GROUPS, stride=STRIDE,
        matmul_dtype=jnp.bfloat16)
    out_bf16 = jax.block_until_ready(out_bf16)
    assert out_bf16.shape == out.shape
    assert bool(jnp.all(jnp.isfinite(out_bf16)))

    print("KERNEL_OK")
</pallas_src>

<mosaic_0001>
module attributes {stable_mosaic.version = 11 : i64} {
  func.func @_fused_sasa_kernel(%arg0: i32, %arg1: i32, %arg2: i32, %arg3: memref<1x4x256xf32, #tpu.memory_space<vmem>>, %arg4: memref<3x1x4x4xf32, #tpu.memory_space<vmem>>, %arg5: memref<9x4xf32, #tpu.memory_space<vmem>>, %arg6: memref<9x256xf32, #tpu.memory_space<vmem>>, %arg7: memref<1x1x4x256xf32, #tpu.memory_space<vmem>>, %arg8: memref<4x512xf32, #tpu.memory_space<vmem>>, %arg9: memref<4x512xf32, #tpu.memory_space<vmem>>) attributes {dimension_semantics = [#tpu.dimension_semantics<parallel>, #tpu.dimension_semantics<parallel>, #tpu.dimension_semantics<arbitrary>], iteration_bounds = array<i64: 2, 2, 1>, scalar_prefetch = 0 : i64, scratch_operands = 2 : i64, tpu.core_type = #tpu.core_type<tc>, window_params = [{transform_indices = @transform_0, window_bounds = array<i64: 1, 4, 256>}, {transform_indices = @transform_1, window_bounds = array<i64: 3, 1, 4, 4>}, {pipeline_mode = #tpu.pipeline_mode<synchronous>, transform_indices = @transform_2, window_bounds = array<i64: 9, 4>}, {transform_indices = @transform_3, window_bounds = array<i64: 9, 256>}, {transform_indices = @transform_4, window_bounds = array<i64: 1, 1, 4, 256>}]} {
    %c0_i32 = arith.constant 0 : i32
    %0 = arith.cmpi eq, %arg2, %c0_i32 : i32
    %1 = arith.extui %0 : i1 to i32
    %c0_i32_0 = arith.constant 0 : i32
    %2 = arith.cmpi ne, %1, %c0_i32_0 : i32
    scf.if %2 {
      %c0_52 = arith.constant 0 : index
      %c0_53 = arith.constant 0 : index
      %c0_54 = arith.constant 0 : index
      %192 = vector.load %arg3[%c0_52, %c0_53, %c0_54] : memref<1x4x256xf32, #tpu.memory_space<vmem>>, vector<1x4x256xf32>
      %193 = vector.shape_cast %192 : vector<1x4x256xf32> to vector<4x256xf32>
      %c1 = arith.constant 1 : index
      %c0_55 = arith.constant 0 : index
      %c0_56 = arith.constant 0 : index
      %c0_57 = arith.constant 0 : index
      %194 = vector.load %arg4[%c1, %c0_55, %c0_56, %c0_57] : memref<3x1x4x4xf32, #tpu.memory_space<vmem>>, vector<1x1x4x4xf32>
      %195 = vector.shape_cast %194 : vector<1x1x4x4xf32> to vector<4x4xf32>
      %cst_58 = arith.constant dense<0.000000e+00> : vector<4x256xf32>
      %196 = tpu.matmul %195, %193, %cst_58 {dimension_numbers = #tpu.dot_dimension_numbers<[1], [0], [0], [1], [0, 0, 1, 1], [], []>, precision = #tpu.contract_precision<fp32>} : vector<4x4xf32>, vector<4x256xf32>, vector<4x256xf32> -> vector<4x256xf32>
      %c2 = arith.constant 2 : index
      %c0_59 = arith.constant 0 : index
      %c0_60 = arith.constant 0 : index
      %c0_61 = arith.constant 0 : index
      %197 = vector.load %arg4[%c2, %c0_59, %c0_60, %c0_61] : memref<3x1x4x4xf32, #tpu.memory_space<vmem>>, vector<1x1x4x4xf32>
      %198 = vector.shape_cast %197 : vector<1x1x4x4xf32> to vector<4x4xf32>
      %cst_62 = arith.constant dense<0.000000e+00> : vector<4x256xf32>
      %199 = tpu.matmul %198, %193, %cst_62 {dimension_numbers = #tpu.dot_dimension_numbers<[1], [0], [0], [1], [0, 0, 1, 1], [], []>, precision = #tpu.contract_precision<fp32>} : vector<4x4xf32>, vector<4x256xf32>, vector<4x256xf32> -> vector<4x256xf32>
      %cst_63 = arith.constant 0.000000e+00 : f32
      %200 = vector.broadcast %cst_63 : f32 to vector<4x128xf32>
      %c0_64 = arith.constant 0 : index
      %c0_65 = arith.constant 0 : index
      %201 = vector.load %arg8[%c0_64, %c0_65] : memref<4x512xf32, #tpu.memory_space<vmem>>, vector<4x128xf32>
      tpu.vector_store %arg8[%c0_64, %c0_65], %200 {strides = array<i32>} : memref<4x512xf32, #tpu.memory_space<vmem>>, vector<4x128xf32>,
      %c0_66 = arith.constant 0 : index
      %c384 = arith.constant 384 : index
      %202 = vector.load %arg8[%c0_66, %c384] : memref<4x512xf32, #tpu.memory_space<vmem>>, vector<4x128xf32>
      tpu.vector_store %arg8[%c0_66, %c384], %200 {strides = array<i32>} : memref<4x512xf32, #tpu.memory_space<vmem>>, vector<4x128xf32>,
      %c0_67 = arith.constant 0 : index
      %c0_68 = arith.constant 0 : index
      %203 = vector.load %arg9[%c0_67, %c0_68] : memref<4x512xf32, #tpu.memory_space<vmem>>, vector<4x128xf32>
      tpu.vector_store %arg9[%c0_67, %c0_68], %200 {strides = array<i32>} : memref<4x512xf32, #tpu.memory_space<vmem>>, vector<4x128xf32>,
      %c0_69 = arith.constant 0 : index
      %c384_70 = arith.constant 384 : index
      %204 = vector.load %arg9[%c0_69, %c384_70] : memref<4x512xf32, #tpu.memory_space<vmem>>, vector<4x128xf32>
      tpu.vector_store %arg9[%c0_69, %c384_70], %200 {strides = array<i32>} : memref<4x512xf32, #tpu.memory_space<vmem>>, vector<4x128xf32>,
      %c0_71 = arith.constant 0 : index
      %c128_72 = arith.constant 128 : index
      %205 = vector.load %arg8[%c0_71, %c128_72] : memref<4x512xf32, #tpu.memory_space<vmem>>, vector<4x256xf32>
      tpu.vector_store %arg8[%c0_71, %c128_72], %196 {strides = array<i32>} : memref<4x512xf32, #tpu.memory_space<vmem>>, vector<4x256xf32>,
      %c0_73 = arith.constant 0 : index
      %c128_74 = arith.constant 128 : index
      %206 = vector.load %arg9[%c0_73, %c128_74] : memref<4x512xf32, #tpu.memory_space<vmem>>, vector<4x256xf32>
      tpu.vector_store %arg9[%c0_73, %c128_74], %199 {strides = array<i32>} : memref<4x512xf32, #tpu.memory_space<vmem>>, vector<4x256xf32>,
    } else {
    }
    %c0 = arith.constant 0 : index
    %c0_1 = arith.constant 0 : index
    %c0_2 = arith.constant 0 : index
    %3 = vector.load %arg3[%c0, %c0_1, %c0_2] : memref<1x4x256xf32, #tpu.memory_space<vmem>>, vector<1x4x256xf32>
    %4 = vector.shape_cast %3 : vector<1x4x256xf32> to vector<4x256xf32>
    %c0_3 = arith.constant 0 : index
    %c0_4 = arith.constant 0 : index
    %c0_5 = arith.constant 0 : index
    %c0_6 = arith.constant 0 : index
    %5 = vector.load %arg4[%c0_3, %c0_4, %c0_5, %c0_6] : memref<3x1x4x4xf32, #tpu.memory_space<vmem>>, vector<1x1x4x4xf32>
    %6 = vector.shape_cast %5 : vector<1x1x4x4xf32> to vector<4x4xf32>
    %cst = arith.constant dense<0.000000e+00> : vector<4x256xf32>
    %7 = tpu.matmul %6, %4, %cst {dimension_numbers = #tpu.dot_dimension_numbers<[1], [0], [0], [1], [0, 0, 1, 1], [], []>, precision = #tpu.contract_precision<fp32>} : vector<4x4xf32>, vector<4x256xf32>, vector<4x256xf32> -> vector<4x256xf32>
    %c0_7 = arith.constant 0 : index
    %c0_8 = arith.constant 0 : index
    %8 = vector.load %arg5[%c0_7, %c0_8] : memref<9x4xf32, #tpu.memory_space<vmem>>, vector<9x4xf32>
    %c0_9 = arith.constant 0 : index
    %c0_10 = arith.constant 0 : index
    %9 = vector.load %arg6[%c0_9, %c0_10] : memref<9x256xf32, #tpu.memory_space<vmem>>, vector<9x256xf32>
    %cst_11 = arith.constant dense<0.000000e+00> : vector<9x256xf32>
    %10 = tpu.matmul %8, %7, %cst_11 {dimension_numbers = #tpu.dot_dimension_numbers<[1], [0], [0], [1], [0, 0, 1, 1], [], []>, precision = #tpu.contract_precision<fp32>} : vector<9x4xf32>, vector<4x256xf32>, vector<9x256xf32> -> vector<9x256xf32>
    %11 = vector.extract_strided_slice %9 {offsets = [0, 0], sizes = [1, 256], strides = [1, 1]} : vector<9x256xf32> to vector<1x256xf32>
    %c0_12 = arith.constant 0 : index
    %c111 = arith.constant 111 : index
    %12 = vector.load %arg8[%c0_12, %c111] : memref<4x512xf32, #tpu.memory_space<vmem>>, vector<4x256xf32>
    %13 = vector.broadcast %11 : vector<1x256xf32> to vector<4x256xf32>
    %14 = arith.mulf %12, %13 : vector<4x256xf32>
    %c0_13 = arith.constant 0 : index
    %c111_14 = arith.constant 111 : index
    %15 = vector.load %arg9[%c0_13, %c111_14] : memref<4x512xf32, #tpu.memory_space<vmem>>, vector<4x256xf32>
    %16 = vector.broadcast %11 : vector<1x256xf32> to vector<4x256xf32>
    %17 = arith.mulf %15, %16 : vector<4x256xf32>
    %18 = arith.mulf %7, %14 : vector<4x256xf32>
    %cst_15 = arith.constant dense<0.000000e+00> : vector<256xf32>
    %19 = vector.multi_reduction <add>, %18, %cst_15 [0] : vector<4x256xf32> to vector<256xf32>
    %20 = vector.shape_cast %19 : vector<256xf32> to vector<1x256xf32>
    %21 = vector.extract_strided_slice %10 {offsets = [0, 0], sizes = [1, 256], strides = [1, 1]} : vector<9x256xf32> to vector<1x256xf32>
    %22 = arith.addf %20, %21 : vector<1x256xf32>
    %23 = vector.extract_strided_slice %9 {offsets = [1, 0], sizes = [1, 256], strides = [1, 1]} : vector<9x256xf32> to vector<1x256xf32>
    %c0_16 = arith.constant 0 : index
    %c112 = arith.constant 112 : index
    %24 = vector.load %arg8[%c0_16, %c112] : memref<4x512xf32, #tpu.memory_space<vmem>>, vector<4x256xf32>
    %25 = vector.broadcast %23 : vector<1x256xf32> to vector<4x256xf32>
    %26 = arith.mulf %24, %25 : vector<4x256xf32>
    %c0_17 = arith.constant 0 : index
    %c112_18 = arith.constant 112 : index
    %27 = vector.load %arg9[%c0_17, %c112_18] : memref<4x512xf32, #tpu.memory_space<vmem>>, vector<4x256xf32>
    %28 = vector.broadcast %23 : vector<1x256xf32> to vector<4x256xf32>
    %29 = arith.mulf %27, %28 : vector<4x256xf32>
    %30 = arith.mulf %7, %26 : vector<4x256xf32>
    %cst_19 = arith.constant dense<0.000000e+00> : vector<256xf32>
    %31 = vector.multi_reduction <add>, %30, %cst_19 [0] : vector<4x256xf32> to vector<256xf32>
    %32 = vector.shape_cast %31 : vector<256xf32> to vector<1x256xf32>
    %33 = vector.extract_strided_slice %10 {offsets = [1, 0], sizes = [1, 256], strides = [1, 1]} : vector<9x256xf32> to vector<1x256xf32>
    %34 = arith.addf %32, %33 : vector<1x256xf32>
    %35 = vector.extract_strided_slice %9 {offsets = [2, 0], sizes = [1, 256], strides = [1, 1]} : vector<9x256xf32> to vector<1x256xf32>
    %c0_20 = arith.constant 0 : index
    %c113 = arith.constant 113 : index
    %36 = vector.load %arg8[%c0_20, %c113] : memref<4x512xf32, #tpu.memory_space<vmem>>, vector<4x256xf32>
    %37 = vector.broadcast %35 : vector<1x256xf32> to vector<4x256xf32>
    %38 = arith.mulf %36, %37 : vector<4x256xf32>
    %c0_21 = arith.constant 0 : index
    %c113_22 = arith.constant 113 : index
    %39 = vector.load %arg9[%c0_21, %c113_22] : memref<4x512xf32, #tpu.memory_space<vmem>>, vector<4x256xf32>
    %40 = vector.broadcast %35 : vector<1x256xf32> to vector<4x256xf32>
    %41 = arith.mulf %39, %40 : vector<4x256xf32>
    %42 = arith.mulf %7, %38 : vector<4x256xf32>
    %cst_23 = arith.constant dense<0.000000e+00> : vector<256xf32>
    %43 = vector.multi_reduction <add>, %42, %cst_23 [0] : vector<4x256xf32> to vector<256xf32>
    %44 = vector.shape_cast %43 : vector<256xf32> to vector<1x256xf32>
    %45 = vector.extract_strided_slice %10 {offsets = [2, 0], sizes = [1, 256], strides = [1, 1]} : vector<9x256xf32> to vector<1x256xf32>
    %46 = arith.addf %44, %45 : vector<1x256xf32>
    %47 = vector.extract_strided_slice %9 {offsets = [3, 0], sizes = [1, 256], strides = [1, 1]} : vector<9x256xf32> to vector<1x256xf32>
    %c0_24 = arith.constant 0 : index
    %c127 = arith.constant 127 : index
    %48 = vector.load %arg8[%c0_24, %c127] : memref<4x512xf32, #tpu.memory_space<vmem>>, vector<4x256xf32>
    %49 = vector.broadcast %47 : vector<1x256xf32> to vector<4x256xf32>
    %50 = arith.mulf %48, %49 : vector<4x256xf32>
    %c0_25 = arith.constant 0 : index
    %c127_26 = arith.constant 127 : index
    %51 = vector.load %arg9[%c0_25, %c127_26] : memref<4x512xf32, #tpu.memory_space<vmem>>, vector<4x256xf32>
    %52 = vector.broadcast %47 : vector<1x256xf32> to vector<4x256xf32>
    %53 = arith.mulf %51, %52 : vector<4x256xf32>
    %54 = arith.mulf %7, %50 : vector<4x256xf32>
    %cst_27 = arith.constant dense<0.000000e+00> : vector<256xf32>
    %55 = vector.multi_reduction <add>, %54, %cst_27 [0] : vector<4x256xf32> to vector<256xf32>
    %56 = vector.shape_cast %55 : vector<256xf32> to vector<1x256xf32>
    %57 = vector.extract_strided_slice %10 {offsets = [3, 0], sizes = [1, 256], strides = [1, 1]} : vector<9x256xf32> to vector<1x256xf32>
    %58 = arith.addf %56, %57 : vector<1x256xf32>
    %59 = vector.extract_strided_slice %9 {offsets = [4, 0], sizes = [1, 256], strides = [1, 1]} : vector<9x256xf32> to vector<1x256xf32>
    %c0_28 = arith.constant 0 : index
    %c128 = arith.constant 128 : index
    %60 = vector.load %arg8[%c0_28, %c128] : memref<4x512xf32, #tpu.memory_space<vmem>>, vector<4x256xf32>
    %61 = vector.broadcast %59 : vector<1x256xf32> to vector<4x256xf32>
    %62 = arith.mulf %60, %61 : vector<4x256xf32>
    %c0_29 = arith.constant 0 : index
    %c128_30 = arith.constant 128 : index
    %63 = vector.load %arg9[%c0_29, %c128_30] : memref<4x512xf32, #tpu.memory_space<vmem>>, vector<4x256xf32>
    %64 = vector.broadcast %59 : vector<1x256xf32> to vector<4x256xf32>
    %65 = arith.mulf %63, %64 : vector<4x256xf32>
    %66 = arith.mulf %7, %62 : vector<4x256xf32>
    %cst_31 = arith.constant dense<0.000000e+00> : vector<256xf32>
    %67 = vector.multi_reduction <add>, %66, %cst_31 [0] : vector<4x256xf32> to vector<256xf32>
    %68 = vector.shape_cast %67 : vector<256xf32> to vector<1x256xf32>
    %69 = vector.extract_strided_slice %10 {offsets = [4, 0], sizes = [1, 256], strides = [1, 1]} : vector<9x256xf32> to vector<1x256xf32>
    %70 = arith.addf %68, %69 : vector<1x256xf32>
    %71 = vector.extract_strided_slice %9 {offsets = [5, 0], sizes = [1, 256], strides = [1, 1]} : vector<9x256xf32> to vector<1x256xf32>
    %c0_32 = arith.constant 0 : index
    %c129 = arith.constant 129 : index
    %72 = vector.load %arg8[%c0_32, %c129] : memref<4x512xf32, #tpu.memory_space<vmem>>, vector<4x256xf32>
    %73 = vector.broadcast %71 : vector<1x256xf32> to vector<4x256xf32>
    %74 = arith.mulf %72, %73 : vector<4x256xf32>
    %c0_33 = arith.constant 0 : index
    %c129_34 = arith.constant 129 : index
    %75 = vector.load %arg9[%c0_33, %c129_34] : memref<4x512xf32, #tpu.memory_space<vmem>>, vector<4x256xf32>
    %76 = vector.broadcast %71 : vector<1x256xf32> to vector<4x256xf32>
    %77 = arith.mulf %75, %76 : vector<4x256xf32>
    %78 = arith.mulf %7, %74 : vector<4x256xf32>
    %cst_35 = arith.constant dense<0.000000e+00> : vector<256xf32>
    %79 = vector.multi_reduction <add>, %78, %cst_35 [0] : vector<4x256xf32> to vector<256xf32>
    %80 = vector.shape_cast %79 : vector<256xf32> to vector<1x256xf32>
    %81 = vector.extract_strided_slice %10 {offsets = [5, 0], sizes = [1, 256], strides = [1, 1]} : vector<9x256xf32> to vector<1x256xf32>
    %82 = arith.addf %80, %81 : vector<1x256xf32>
    %83 = vector.extract_strided_slice %9 {offsets = [6, 0], sizes = [1, 256], strides = [1, 1]} : vector<9x256xf32> to vector<1x256xf32>
    %c0_36 = arith.constant 0 : index
    %c143 = arith.constant 143 : index
    %84 = vector.load %arg8[%c0_36, %c143] : memref<4x512xf32, #tpu.memory_space<vmem>>, vector<4x256xf32>
    %85 = vector.broadcast %83 : vector<1x256xf32> to vector<4x256xf32>
    %86 = arith.mulf %84, %85 : vector<4x256xf32>
    %c0_37 = arith.constant 0 : index
    %c143_38 = arith.constant 143 : index
    %87 = vector.load %arg9[%c0_37, %c143_38] : memref<4x512xf32, #tpu.memory_space<vmem>>, vector<4x256xf32>
    %88 = vector.broadcast %83 : vector<1x256xf32> to vector<4x256xf32>
    %89 = arith.mulf %87, %88 : vector<4x256xf32>
    %90 = arith.mulf %7, %86 : vector<4x256xf32>
    %cst_39 = arith.constant dense<0.000000e+00> : vector<256xf32>
    %91 = vector.multi_reduction <add>, %90, %cst_39 [0] : vector<4x256xf32> to vector<256xf32>
    %92 = vector.shape_cast %91 : vector<256xf32> to vector<1x256xf32>
    %93 = vector.extract_strided_slice %10 {offsets = [6, 0], sizes = [1, 256], strides = [1, 1]} : vector<9x256xf32> to vector<1x256xf32>
    %94 = arith.addf %92, %93 : vector<1x256xf32>
    %95 = vector.extract_strided_slice %9 {offsets = [7, 0], sizes = [1, 256], strides = [1, 1]} : vector<9x256xf32> to vector<1x256xf32>
    %c0_40 = arith.constant 0 : index
    %c144 = arith.constant 144 : index
    %96 = vector.load %arg8[%c0_40, %c144] : memref<4x512xf32, #tpu.memory_space<vmem>>, vector<4x256xf32>
    %97 = vector.broadcast %95 : vector<1x256xf32> to vector<4x256xf32>
    %98 = arith.mulf %96, %97 : vector<4x256xf32>
    %c0_41 = arith.constant 0 : index
    %c144_42 = arith.constant 144 : index
    %99 = vector.load %arg9[%c0_41, %c144_42] : memref<4x512xf32, #tpu.memory_space<vmem>>, vector<4x256xf32>
    %100 = vector.broadcast %95 : vector<1x256xf32> to vector<4x256xf32>
    %101 = arith.mulf %99, %100 : vector<4x256xf32>
    %102 = arith.mulf %7, %98 : vector<4x256xf32>
    %cst_43 = arith.constant dense<0.000000e+00> : vector<256xf32>
    %103 = vector.multi_reduction <add>, %102, %cst_43 [0] : vector<4x256xf32> to vector<256xf32>
    %104 = vector.shape_cast %103 : vector<256xf32> to vector<1x256xf32>
    %105 = vector.extract_strided_slice %10 {offsets = [7, 0], sizes = [1, 256], strides = [1, 1]} : vector<9x256xf32> to vector<1x256xf32>
    %106 = arith.addf %104, %105 : vector<1x256xf32>
    %107 = vector.extract_strided_slice %9 {offsets = [8, 0], sizes = [1, 256], strides = [1, 1]} : vector<9x256xf32> to vector<1x256xf32>
    %c0_44 = arith.constant 0 : index
    %c145 = arith.constant 145 : index
    %108 = vector.load %arg8[%c0_44, %c145] : memref<4x512xf32, #tpu.memory_space<vmem>>, vector<4x256xf32>
    %109 = vector.broadcast %107 : vector<1x256xf32> to vector<4x256xf32>
    %110 = arith.mulf %108, %109 : vector<4x256xf32>
    %c0_45 = arith.constant 0 : index
    %c145_46 = arith.constant 145 : index
    %111 = vector.load %arg9[%c0_45, %c145_46] : memref<4x512xf32, #tpu.memory_space<vmem>>, vector<4x256xf32>
    %112 = vector.broadcast %107 : vector<1x256xf32> to vector<4x256xf32>
    %113 = arith.mulf %111, %112 : vector<4x256xf32>
    %114 = arith.mulf %7, %110 : vector<4x256xf32>
    %cst_47 = arith.constant dense<0.000000e+00> : vector<256xf32>
    %115 = vector.multi_reduction <add>, %114, %cst_47 [0] : vector<4x256xf32> to vector<256xf32>
    %116 = vector.shape_cast %115 : vector<256xf32> to vector<1x256xf32>
    %117 = vector.extract_strided_slice %10 {offsets = [8, 0], sizes = [1, 256], strides = [1, 1]} : vector<9x256xf32> to vector<1x256xf32>
    %118 = arith.addf %116, %117 : vector<1x256xf32>
    %119 = arith.maximumf %22, %34 : vector<1x256xf32>
    %120 = arith.maximumf %119, %46 : vector<1x256xf32>
    %121 = arith.maximumf %120, %58 : vector<1x256xf32>
    %122 = arith.maximumf %121, %70 : vector<1x256xf32>
    %123 = arith.maximumf %122, %82 : vector<1x256xf32>
    %124 = arith.maximumf %123, %94 : vector<1x256xf32>
    %125 = arith.maximumf %124, %106 : vector<1x256xf32>
    %126 = arith.maximumf %125, %118 : vector<1x256xf32>
    %127 = arith.subf %22, %126 : vector<1x256xf32>
    %128 = math.exp %127 : vector<1x256xf32>
    %129 = arith.subf %34, %126 : vector<1x256xf32>
    %130 = math.exp %129 : vector<1x256xf32>
    %131 = arith.subf %46, %126 : vector<1x256xf32>
    %132 = math.exp %131 : vector<1x256xf32>
    %133 = arith.subf %58, %126 : vector<1x256xf32>
    %134 = math.exp %133 : vector<1x256xf32>
    %135 = arith.subf %70, %126 : vector<1x256xf32>
    %136 = math.exp %135 : vector<1x256xf32>
    %137 = arith.subf %82, %126 : vector<1x256xf32>
    %138 = math.exp %137 : vector<1x256xf32>
    %139 = arith.subf %94, %126 : vector<1x256xf32>
    %140 = math.exp %139 : vector<1x256xf32>
    %141 = arith.subf %106, %126 : vector<1x256xf32>
    %142 = math.exp %141 : vector<1x256xf32>
    %143 = arith.subf %118, %126 : vector<1x256xf32>
    %144 = math.exp %143 : vector<1x256xf32>
    %145 = arith.addf %128, %130 : vector<1x256xf32>
    %146 = arith.addf %145, %132 : vector<1x256xf32>
    %147 = arith.addf %146, %134 : vector<1x256xf32>
    %148 = arith.addf %147, %136 : vector<1x256xf32>
    %149 = arith.addf %148, %138 : vector<1x256xf32>
    %150 = arith.addf %149, %140 : vector<1x256xf32>
    %151 = arith.addf %150, %142 : vector<1x256xf32>
    %152 = arith.addf %151, %144 : vector<1x256xf32>
    %153 = tpu.reciprocal %152 : vector<1x256xf32> -> vector<1x256xf32>
    %154 = arith.mulf %128, %153 : vector<1x256xf32>
    %155 = vector.broadcast %154 : vector<1x256xf32> to vector<4x256xf32>
    %156 = arith.mulf %155, %17 : vector<4x256xf32>
    %157 = arith.mulf %130, %153 : vector<1x256xf32>
    %158 = vector.broadcast %157 : vector<1x256xf32> to vector<4x256xf32>
    %159 = arith.mulf %158, %29 : vector<4x256xf32>
    %160 = arith.addf %156, %159 : vector<4x256xf32>
    %161 = arith.mulf %132, %153 : vector<1x256xf32>
    %162 = vector.broadcast %161 : vector<1x256xf32> to vector<4x256xf32>
    %163 = arith.mulf %162, %41 : vector<4x256xf32>
    %164 = arith.addf %160, %163 : vector<4x256xf32>
    %165 = arith.mulf %134, %153 : vector<1x256xf32>
    %166 = vector.broadcast %165 : vector<1x256xf32> to vector<4x256xf32>
    %167 = arith.mulf %166, %53 : vector<4x256xf32>
    %168 = arith.addf %164, %167 : vector<4x256xf32>
    %169 = arith.mulf %136, %153 : vector<1x256xf32>
    %170 = vector.broadcast %169 : vector<1x256xf32> to vector<4x256xf32>
    %171 = arith.mulf %170, %65 : vector<4x256xf32>
    %172 = arith.addf %168, %171 : vector<4x256xf32>
    %173 = arith.mulf %138, %153 : vector<1x256xf32>
    %174 = vector.broadcast %173 : vector<1x256xf32> to vector<4x256xf32>
    %175 = arith.mulf %174, %77 : vector<4x256xf32>
    %176 = arith.addf %172, %175 : vector<4x256xf32>
    %177 = arith.mulf %140, %153 : vector<1x256xf32>
    %178 = vector.broadcast %177 : vector<1x256xf32> to vector<4x256xf32>
    %179 = arith.mulf %178, %89 : vector<4x256xf32>
    %180 = arith.addf %176, %179 : vector<4x256xf32>
    %181 = arith.mulf %142, %153 : vector<1x256xf32>
    %182 = vector.broadcast %181 : vector<1x256xf32> to vector<4x256xf32>
    %183 = arith.mulf %182, %101 : vector<4x256xf32>
    %184 = arith.addf %180, %183 : vector<4x256xf32>
    %185 = arith.mulf %144, %153 : vector<1x256xf32>
    %186 = vector.broadcast %185 : vector<1x256xf32> to vector<4x256xf32>
    %187 = arith.mulf %186, %113 : vector<4x256xf32>
    %188 = arith.addf %184, %187 : vector<4x256xf32>
    %c0_48 = arith.constant 0 : index
    %c0_49 = arith.constant 0 : index
    %c0_50 = arith.constant 0 : index
    %c0_51 = arith.constant 0 : index
    %189 = vector.load %arg7[%c0_48, %c0_49, %c0_50, %c0_51] : memref<1x1x4x256xf32, #tpu.memory_space<vmem>>, vector<1x1x4x256xf32>
    %190 = vector.shape_cast %189 : vector<1x1x4x256xf32> to vector<4x256xf32>
    %191 = vector.shape_cast %188 : vector<4x256xf32> to vector<1x1x4x256xf32>
    tpu.vector_store %arg7[%c0_48, %c0_49, %c0_50, %c0_51], %191 {strides = array<i32>} : memref<1x1x4x256xf32, #tpu.memory_space<vmem>>, vector<1x1x4x256xf32>,
    return
  }
  func.func @transform_0(%arg0: i32, %arg1: i32, %arg2: i32) -> (i32, i32, i32) {
    %c0_i32 = arith.constant 0 : i32
    %c0_i32_0 = arith.constant 0 : i32
    %c0_i32_1 = arith.constant 0 : i32
    return %arg0, %c0_i32, %c0_i32_0 : i32, i32, i32
  }
  func.func @transform_1(%arg0: i32, %arg1: i32, %arg2: i32) -> (i32, i32, i32, i32) {
    %c0_i32 = arith.constant 0 : i32
    %c0_i32_0 = arith.constant 0 : i32
    %c0_i32_1 = arith.constant 0 : i32
    %c0_i32_2 = arith.constant 0 : i32
    return %c0_i32, %arg1, %c0_i32_0, %c0_i32_1 : i32, i32, i32, i32
  }
  func.func @transform_2(%arg0: i32, %arg1: i32, %arg2: i32) -> (i32, i32) {
    %c0_i32 = arith.constant 0 : i32
    %c0_i32_0 = arith.constant 0 : i32
    %c0_i32_1 = arith.constant 0 : i32
    return %c0_i32, %c0_i32_0 : i32, i32
  }
  func.func @transform_3(%arg0: i32, %arg1: i32, %arg2: i32) -> (i32, i32) {
    %c0_i32 = arith.constant 0 : i32
    %c0_i32_0 = arith.constant 0 : i32
    return %c0_i32, %arg2 : i32, i32
  }
  func.func @transform_4(%arg0: i32, %arg1: i32, %arg2: i32) -> (i32, i32, i32, i32) {
    %c0_i32 = arith.constant 0 : i32
    %c0_i32_0 = arith.constant 0 : i32
    return %arg0, %arg1, %c0_i32, %arg2 : i32, i32, i32, i32
  }
}

</mosaic_0001>

<bundles_post_ra>
// kernel: tpu_custom_call.1
= control target key start
LH: loop header
LB: loop body
LE: loop exit
PB: predicated region body
PF: predicated region fallthrough
CT: control target
= control target key end

     0   :  { %s4767_s0 = inlined_call_operand.vmem [shape: f32[2,4,256], index: 0, kind: input, shape index: {}]   ;;  %s4768_s1 = inlined_call_operand.hbm [shape: f32[3,2,4,4], index: 1, kind: input, shape index: {}]   ;;  %s4769_s2 = inlined_call_operand.vmem [shape: f32[9,4], index: 2, kind: input, shape index: {}]   ;;  %s4770_s3 = inlined_call_operand.hbm [shape: f32[9,256], index: 3, kind: input, shape index: {}]   ;;  %s4771_s4 = inlined_call_operand.hbm [shape: f32[2,2,4,256], index: 4, kind: output, shape index: {}]  }
   0x1   :  { %4791 = sst [smem:[#allocation23_spill]] %s4770_s3 }
   0x2   :  { %4792 = sst [smem:[#allocation24_spill]] %s4771_s4 }
   0x3   :  { %9 = vsyncpa [#allocation5], 0 }
   0x4   :  { %11 = vsyncpa [#allocation5 + $0x1], 0 }
   0x5   :  { %12 = vsyncpa [#allocation8], 0 }
   0x6   :  { %13 = vsyncpa [#allocation6], 0 }
   0x7   :  { %15 = vsyncpa [#allocation6 + $0x1], 0  ;;  %s3743_s15 = smov 0   ;;  %s3745_s16 = smov 0  }
   0x8   :  { %s3747_s17 = smov 0   ;;  %s3749_s18 = smov 0  }
   0x9   :  { %s3751_s19 = smov 0   ;;  %s3753_s20 = smov 0  }
   0xa   :  { %s3755_s21 = smov 0   ;;  %s3757_s22 = smov 0  }
   0xb   :  { %s3759_s23 = smov 0   ;;  %s3761_s24 = smov 0  }
   0xc   :  { %s3763_s25 = smov 0  }
   0xd LB: > { %4793 = sst [smem:[#allocation13_spill]] %s3659_s15  ;;  %s3329_s26 = sadd.s32 4294967295, %s3699_s25   ;;  %s3699_s25 = sphi %s3763_s25, %s21_s25   ;;  %s3695_s24 = sphi %s3761_s24, %s4837_s24   ;;  %s3691_s23 = sphi %s3759_s23, %s4828_s23   ;;  %s3687_s22 = sphi %s3757_s22, %s4836_s22   ;;  %s3683_s21 = sphi %s3755_s21, %s4827_s21   ;;  %s3679_s20 = sphi %s3753_s20, %s4835_s20   ;;  %s3675_s19 = sphi %s3751_s19, %s4834_s19   ;;  %s3671_s18 = sphi %s3749_s18, %s4833_s18   ;;  %s3667_s17 = sphi %s3747_s17, %s4832_s17   ;;  %s3663_s16 = sphi %s3745_s16, %s4831_s16   ;;  %s3659_s15 = sphi %s3743_s15, %s4830_s15  }
   0xe   : > { %4794 = sst [smem:[#allocation14_spill]] %s3691_s23  ;;  %s3330_s27 = sadd.s32 4294967294, %s3699_s25  }
   0xf   : > { %4795 = sst [smem:[#allocation15_spill]] %s3699_s25  ;;  %p80_p0 = scmp.ne.s32.totalorder %s3679_s20, %s3675_s19 }
  0x10   : > { %p81_p1 = scmp.eq.s32.totalorder %s3699_s25, 0  ;;  %p86_p2 = scmp.ne.s32.totalorder %s3675_s19, %s3671_s18 }
  0x11   : > { %p3803_p3 = scmp.eq.s32.totalorder %s3329_s26, 0  ;;  %p160_p5 = scmp.ne.s32.totalorder %s3667_s17, %s3663_s16 }
  0x12   : > { %p3808_p4 = por %p81_p1, %p80_p0  ;;  %p161_p7 = scmp.eq.s32.totalorder %s3329_s26, 3 }
  0x13   : > { %p3816_p6 = por %p3803_p3, %p86_p2  ;;  %p166_p8 = scmp.ne.s32.totalorder %s3663_s16, %s3659_s15 }
  0x14   : > { %p167_p9 = scmp.eq.s32.totalorder %s3330_s27, 3  ;;  %p3822_p10 = por %p161_p7, %p160_p5 }
  0x15   : > { %s4798_s6 = scalar_select %p3816_p6, 1, 0 }
  0x16   : > { %s4799_s7 = scalar_select %p3822_p10, 1, 0 }
  0x17   : > { %p3331_p11 = scmp.ge.s32.totalorder %s3699_s25, 1  ;;  %p3827_p12 = por %p167_p9, %p166_p8 }
  0x18   : > { %4800 = sst [smem:[#allocation16_spill]] %s4799_s7  ;;  %p174_p13 = scmp.lt.s32.totalorder %s3699_s25, 5 }
  0x19   : > { %s4801_s8 = scalar_select %p3827_p12, 1, 0 }
  0x1a   : > { %p3832_p0 = pnand %p3331_p11, %p174_p13  ;;  %s3701_s10 = smov [#allocation7]  }
  0x1b   : > { %4802 = sst [smem:[#allocation17_spill]] %s4801_s8  ;;  %s192_s11 = sshll.u32 %s3701_s10, 4  ;;  %s193_s11 = int_to_ptr.vmem [resolvable:$true] %s192_s11 }
  0x1c   : > { %s4803_s9 = scalar_select %p3832_p0, 1, 0 }
  0x1d   : > { %p3361_p1 = pneg %p3832_p0  ;;  %p3374_p2 = scmp.lt.s32.totalorder %s3699_s25, 4 }
  0x1e   : > { %s3532_s14 = scalar_lea.vmem %s193_s11, 512  ;;  %p3540_p12 = scmp.lt.s32.totalorder %s193_s11, %s193_s11 }
  0x1f   : > { %p3841_p5 = pnand %p3361_p1, %p3803_p3  ;;  %p3847_p7 = pnand %p3374_p2, %p3808_p4 }
  0x20   : > { %p3533_p9 = scmp.ne.s32.totalorder %s193_s11, %s3532_s14  ;;  %p3541_p10 = scmp.lt.s32.totalorder %s3532_s14, %s3532_s14 }
  0x21   : > { %p3523_p8 = pneg %p3841_p5 }
  0x22   : > { %p3542_p6 = por %p3541_p10, %p3540_p12 }
  0x23   : > { %p3535_p11 = pnand %p3533_p9, %p3523_p8 }
  0x25   : > { %p3536_p13 = pneg %p3535_p11 }
  0x27   : > { %p3543_p0 = pnand %p3542_p6, %p3536_p13 }
  0x29   : > { %3546 = shalt.err (!%p3543_p0)
}
  0x2a   : > { %s3702_s18 = smov 256   ;;  %s3703_s26 = smov 16  }
  0x2b   : > { %s4806_s3 = sld [smem:[#allocation23_spill]]  ;;  %s36_s10 = sadd.s32 1, %s3691_s23 }
  0x2c   : > { %s40_s14 = sadd.s32 1, %s3695_s24  ;;  %p38_p4 = scmp.ge.s32.totalorder %s36_s10, 2 }
  0x2d   : > { %s214_s30 = sand.u32 1, %s3679_s20   ;;  %s3334_s27 = sshll.u32 %s3691_s23, 6 }
  0x2e   : > { %s3351_s28 = smul.u32 12, %s214_s30  ;;  %s4839_s10 = smov (%p38_p4, %s36_s10), 0 }
  0x2f   : > { %4807 = sst [smem:[#allocation18_spill]] %s4839_s10  ;;  %s4841_s14 = smov (!%p38_p4, %s40_s14), %s3695_s24 }
  0x30   : > { %s70_s12 = ssub.s32 %s3691_s23, %s4839_s10  ;;  %p42_p6 = scmp.ge.s32.totalorder %s4841_s14, 2 }
  0x31   : > { %3364 = dma.hbm_to_vmem [thread:$0]  (!%p3841_p5), %s4806_s3, 512, %s193_s11, [#allocation8], %s3702_s18, %s3702_s18, %s3703_s26  }
  0x32   : > { %p71_p10 = scmp.eq.s32.totalorder %s70_s12, 0  ;;  %s218_s5 = scalar_lea.vmem [#allocation4], %s3351_s28 }
  0x33   : > { %s224_s8 = sshll.u32 %s218_s5, 4  ;;  %s4843_s14 = smov (%p42_p6, %s4841_s14), 0  ;;  %s225_s8 = int_to_ptr.vmem [resolvable:$true] %s224_s8 }
  0x34   : > { %4808 = sst [smem:[#allocation19_spill]] %s4843_s14  ;;  %s4809_s11 = sadd.s32 1, %s3679_s20 }
  0x35   : > { %s3872_s18 = scalar_select %p71_p10, %s3679_s20, %s4809_s11  }
  0x36   : > { %s143_s26 = ssub.s32 %s3695_s24, %s4843_s14  ;;  %s223_s25 = scalar_lea.hbm %s4768_s1, %s3334_s27 }
  0x37   : > { %s145_s4 = sor.u32 %s143_s26, %s70_s12  ;;  %s4810_s10 = sadd.s32 1, %s3667_s17 }
  0x38   : > { %p148_p12 = scmp.eq.s32.totalorder %s145_s4, 0  ;;  %s215_s23 = scalar_lea.sflag [#allocation5], %s214_s30 }
  0x39   : > { %p3549_p0 = pneg %p3847_p7  ;;  %s3560_s28 = scalar_lea.vmem %s225_s8, 192 }
  0x3a   : > { %s3882_s7 = scalar_select %p148_p12, %s3667_s17, %s4810_s10  }
  0x3b   : > { %p3561_p1 = scmp.ne.s32.totalorder %s225_s8, %s3560_s28  ;;  %s3704_s5 = smov [#allocation4]  }
  0x3c   : > { %s3565_s11 = sshll.u32 %s3704_s5, 4  ;;  %s3566_s11 = int_to_ptr.vmem [resolvable:$false] %s3565_s11 }
  0x3d   : > { %p3563_p2 = pnand %p3561_p1, %p3549_p0  ;;  %s3567_s14 = scalar_lea.vmem %s3566_s11, 384 }
  0x3e   : > { %p3568_p8 = scmp.lt.s32.totalorder %s225_s8, %s3566_s11  ;;  %p3569_p9 = scmp.lt.s32.totalorder %s3567_s14, %s3560_s28 }
  0x3f   : > { %p3564_p5 = pneg %p3563_p2 }
  0x40   : > { %p3570_p11 = por %p3569_p9, %p3568_p8 }
  0x42   : > { %p3571_p13 = pnand %p3570_p11, %p3564_p5 }
  0x44   : > { %3574 = shalt.err (!%p3571_p13)
}
  0x45   : > { %s3705_s3 = smov 128   ;;  %s3706_s4 = smov 64  }
  0x46   : > { %s3707_s15 = smov 4   ;;  %p4811_p4 = scmp.ne.s32.totalorder %s4803_s9, 0 }
  0x47   : > { %3368 = dma.hbm_to_vmem [thread:$0]  (!%p3847_p7), %s223_s25, 192, %s225_s8, %s215_s23, %s3705_s3, %s3706_s4, %s3707_s15  }
  0x48   : > { %236 = sbr.rel (%p4811_p4) target bundleno = 680 (0x2a8), region = 36 }
  0x4d   : > { %s238_s30 = sand.u32 1, %s3675_s19   ;;  %p4812_p6 = scmp.ne.s32.totalorder %s4798_s6, 0 }
  0x4e   : > { %s3352_s10 = smul.u32 12, %s238_s30  ;;  %s239_s12 = scalar_lea.sflag [#allocation5], %s238_s30 }
  0x50   : > { %s3891_s27 = scalar_lea.vmem [#allocation4], %s3352_s10 }
  0x51   : > { %3646 = dma.done.wait (%p4812_p6), %s239_s12, 192  }
  0x52   : > { %3648 = vsyncadd (%p4812_p6), %s239_s12, 4294967104 }
  0x53   : > { %3650 = dma.done.wait (%p3803_p3), [#allocation8], 512  }
  0x54   : > { %3652 = vsyncadd (%p3803_p3), [#allocation8], 4294966784  ;;  %p276_p7 = scmp.lt.s32.totalorder %s3687_s22, 1  ;;  %v2262_v0 = vlaneseq  ;;  %v3708_v1 = vmov 0.0   ;;  %vm296_vm0 = vcmask 1043456   ;;  %vm292_vm1 = vcmask 31744  }
  0x55   : > { %367 = vmatprep.mubr.f32.mxu0 %v3708_v1  ;;  %1236 = vst [vmem:[#allocation2] sm:$0xf] %v3708_v1  ;;  %1237 = vst [vmem:[#allocation2 + $0xc] sm:$0xf] %v3708_v1  ;;  %453 = vmatprep.mubr.f32.mxu1 %v3708_v1  ;;  %v3340_v5 = vld [vmem:[%s3891_s27 + $0x4] sm:$0xf] }
  0x56   : > { %1238 = vst [vmem:[#allocation3] sm:$0xf] %v3708_v1  ;;  %1239 = vst [vmem:[#allocation3 + $0xc] sm:$0xf] %v3708_v1  ;;  %s277_s23 = scalar_select %p276_p7, %s3687_s22, 1  ;;  %v3909_v2 = vshrl.u32 %v2262_v0, 7 }
  0x57   : > { %v3341_v6 = vld [vmem:[%s3891_s27 + $0x8] sm:$0xf]  ;;  %v294_v10 = vsel %vm292_vm1, %v3340_v5, 0  ;;  %v3925_v12 = vld [vmem:[#allocation7] sm:$0xff]  ;;  %v3931_v15 = vld [vmem:[#allocation7 + $0x8] sm:$0xff]  ;;  %s3709_s9 = smov 113  }
  0x58   : > { %s3350_s25 = sshll.u32 %s277_s23, 3  ;;  %v3915_v3 = vsub.s32 2, %v3909_v2  ;;  %v3920_v7 = vsub.s32 1, %v3909_v2  ;;  %v769_v11 = vsel %vm292_vm1, %v3341_v6, 0  ;;  %v3929_v14 = vand.u32 4294901760, %v294_v10  ;;  %s3710_s13 = smov 112  }
  0x59   : > { %s280_s8 = scalar_lea.vmem %s4767_s0, %s3350_s25  ;;  %v3939_v19 = vsub.s32 3, %v3909_v2  ;;  %v3947_v23 = vand.u32 4294901760, %v769_v11  ;;  %v3954_v27 = vsub.s32 0, %v3909_v2  ;;  %v1251_v43 = vld [vmem:[%s3891_s27] sm:$0xf]  ;;  %s3711_s14 = smov 127  }
  0x5a   : > { %v287_v4 = vld [vmem:[%s280_s8] sm:$0xff]  ;;  %v2375_v17 = vrot.slane %v3925_v12, %v3915_v3  ;;  %v2379_v18 = vrot.slane %v3931_v15, %v3915_v3  ;;  %v369_v21 = vsub.f32 %v294_v10, %v3929_v14  ;;  %v2321_v25 = vrot.slane %v3925_v12, %v3920_v7  ;;  %s3712_s26 = smov 111   ;;  %v3342_v6 = vld [vmem:[#allocation7 + $0x10] ss:$0 sm:$0xff]  ;;  %s3713_s28 = smov 15  }
  0x5b   : > { %v291_v8 = vcombine.high %v287_v4, %v287_v4  ;;  %v297_v9 = vsel %vm296_vm0, %v287_v4, 0  ;;  %v2325_v26 = vrot.slane %v3931_v15, %v3920_v7  ;;  %v2429_v32 = vrot.slane %v3925_v12, %v3939_v19  ;;  %s3714_s5 = smov 1   ;;  %s3715_s11 = smov 17  }
  0x5c   : > { %v3927_v13 = vand.u32 4294901760, %v297_v9  ;;  %v2382_v24 = vcombine.low %v2375_v17, %v2379_v18  ;;  %v370_v28 = vand.u32 4294901760, %v369_v21  ;;  %v2433_v33 = vrot.slane %v3931_v15, %v3939_v19  ;;  %s3716_s3 = smov 16   ;;  %s273_s12 = sand.u32 1, %s3663_s16  }
  0x5d   : > { %v299_v16 = vsel %vm296_vm0, %v291_v8, 0  ;;  %v2328_v31 = vcombine.low %v2321_v25, %v2325_v26  ;;  %v839_v37 = vsub.f32 %v769_v11, %v3947_v23  ;;  %v2265_v39 = vrot.slane %v3925_v12, %v3954_v27  ;;  %v3343_v8 = vld [vmem:[#allocation7 + $0x18] ss:$0 sm:$0xff]  ;;  %s3337_s27 = sshll.u32 %s273_s12, 3  ;;  %s3345_s23 = sshll.u32 %s3683_s21, 1 }
  0x5e   : > { %v3941_v20 = vand.u32 4294901760, %v299_v16  ;;  %v3945_v22 = vsub.f32 %v297_v9, %v3927_v13  ;;  %2383 = vrot.lane.b32.xlu1 %v2382_v24, %s3709_s9  ;;  %v371_v34 = vsub.f32 %v369_v21, %v370_v28  ;;  %v2436_v38 = vcombine.low %v2429_v32, %v2433_v33  ;;  %s3346_s25 = sshll.u32 %s3687_s22, 2  ;;  %s4819_s29 = sld [smem:[#allocation16_spill]] }
  0x5f   : > { %2329 = vrot.lane.b32.xlu0 %v2328_v31, %s3710_s13  ;;  %v2269_v40 = vrot.slane %v3931_v15, %v3954_v27  ;;  %v840_v47 = vand.u32 4294901760, %v839_v37  ;;  %v1256_v48 = vsel %vm292_vm1, %v1251_v43, 0  ;;  %v4031_v56 = vsub.s32 6, %v3909_v2  ;;  %s3212_s6 = sadd.s32 %s3346_s25, %s3345_s23  ;;  %s275_s22 = scalar_lea.vmem [#allocation9], %s3337_s27 }
  0x60   : > { %332 = vmatprep.subr.mxu0 %v3941_v20  ;;  %v3958_v29 = vsub.f32 %v299_v16, %v3941_v20  ;;  %v3961_v30 = vand.u32 4294901760, %v3945_v22  ;;  %v372_v41 = vand.u32 4294901760, %v371_v34  ;;  %v3994_v50 = vand.u32 4294901760, %v1256_v48  ;;  %s3347_s21 = sshll.u32 %s3212_s6, 6  ;;  %s3216_s8 = sshll.u32 %s275_s22, 4  ;;  %s3217_s8 = int_to_ptr.vmem [resolvable:$true] %s3216_s8 }
  0x61   : > { %334 = vmatpush1.msra.mxu0 %v3927_v13  ;;  %v2272_v45 = vcombine.low %v2265_v39, %v2269_v40  ;;  %v841_v49 = vsub.f32 %v839_v37, %v840_v47  ;;  %4813 = vst [vmem:[#allocation20_spill] sm:$0xff] %v4031_v56  ;;  %v4036_v57 = vsub.s32 5, %v3909_v2  ;;  %v2576_v58 = vrot.slane %v3925_v12, %v4031_v56 }
  0x62   : > { %v3970_v35 = vand.u32 4294901760, %v3958_v29  ;;  %493 = vmatprep.subr.mxu0 %v3958_v29  ;;  %v418_v36 = vsub.f32 %v3945_v22, %v3961_v30  ;;  %2437 = vrot.lane.b32.xlu1 %v2436_v38, %s3711_s14  ;;  %v4004_v52 = vsub.f32 %v1256_v48, %v3994_v50  ;;  %v2580_v59 = vrot.slane %v3931_v15, %v4031_v56 }
  0x63   : > { %373 = vmatmul.mubr.f32.vlgmr.msra.gmra.mxu0 %v372_v41  ;;  %2273 = vrot.lane.b32.xlu0 %v2272_v45, %s3712_s26  ;;  %v842_v51 = vand.u32 4294901760, %v841_v49  ;;  %4814 = vst [vmem:[#allocation21_spill] sm:$0xff] %v4036_v57  ;;  %v2522_v60 = vrot.slane %v3925_v12, %v4036_v57  ;;  %v2526_v61 = vrot.slane %v3931_v15, %v4036_v57  ;;  %v4053_v62 = vsub.s32 7, %v3909_v2 }
  0x64   : > { %v412_v42 = vsub.f32 %v3958_v29, %v3970_v35  ;;  %v3984_v44 = vand.u32 4294901760, %v418_v36  ;;  %496 = vmatpush1.msra.mxu0 %v3945_v22  ;;  %529 = vmatprep.mubr.f32.mxu0 %v3708_v1  ;;  %v1332_v53 = vand.u32 4294901760, %v4004_v52  ;;  %v2583_v63 = vcombine.low %v2576_v58, %v2580_v59  ;;  %p4821_p10 = scmp.ne.s32.totalorder %s4819_s29, 0 }
  0x65   : > { %647 = vmatprep.subr.mxu0 %v3970_v35  ;;  %4815 = vst [vmem:[#allocation22_spill] sm:$0xff] %v4053_v62  ;;  %v2529_v0 = vcombine.low %v2522_v60, %v2526_v61  ;;  %v2628_v4 = vrot.slane %v3925_v12, %v4053_v62  ;;  %v2632_v5 = vrot.slane %v3931_v15, %v4053_v62  ;;  %vm2403_vm2 = vcmask 121856  }
  0x66   : > { %v413_v46 = vand.u32 4294901760, %v412_v42  ;;  %v1333_v54 = vsub.f32 %v4004_v52, %v1332_v53  ;;  %2584 = vrot.lane.b32.xlu1 %v2583_v63, %s3713_s28  ;;  %v2687_v9 = vcombine.low %v3342_v6, %v3343_v8  ;;  %vm2457_vm3 = vcmask 7168   ;;  %v1728_v6 = vld [vmem:[%s4769_s2] sm:$0xff] }
  0x67   : > { %532 = vmatmul.mubr.f32.vlgmr.msra.gmra.mxu0 %v369_v21  ;;  %2530 = vrot.lane.b32.xlu0 %v2529_v0, %s3714_s5  ;;  %v2635_v10 = vcombine.low %v2628_v4, %v2632_v5  ;;  %vm2332_vm4 = vcmask 916480   ;;  %vm2276_vm5 = vcmask 908288   ;;  %vm2386_vm6 = vcmask 924672  }
  0x68   : > { %414 = vmatprep.subr.mxu1 %v413_v46  ;;  %651 = vmatpush1.msra.mxu0 %v3961_v30  ;;  %v1334_v55 = vand.u32 4294901760, %v1333_v54  ;;  %vm2440_vm7 = vcmask 1039360   ;;  %vm2349_vm8 = vcmask 130048   ;;  %vm2295_vm9 = vcmask 138240  }
  0x69   : > { %420 = vmatpush1.msra.mxu1 %v3984_v44  ;;  %684 = vmatprep.mubr.f32.mxu0 %v3708_v1 }
  0x6a   : > { %455 = vmatmul.mubr.f32.vlgmr.msra.gmra.mxu1 %v3929_v14  ;;  %569 = vmatprep.subr.mxu1 %v3941_v20 }
  0x6b   : > { %604 = vmatprep.mubr.f32.mxu1 %v3708_v1  ;;  %571 = vmatpush1.msra.mxu1 %v3927_v13 }
  0x6c   : > { %723 = vmatprep.subr.mxu1 %v3941_v20  ;;  %686 = vmatmul.mubr.f32.vlgmr.msra.gmra.mxu0 %v3929_v14 }
  0x6d   : > { %802 = vmatprep.subr.mxu0 %v3941_v20  ;;  %837 = vmatprep.mubr.f32.mxu0 %v3708_v1 }
  0x6e   : > { %608 = vmatmul.mubr.f32.vlgmr.msra.gmra.mxu1 %v370_v28  ;;  %804 = vmatpush1.msra.mxu0 %v3927_v13 }
  0x6f   : > { %725 = vmatpush1.msra.mxu1 %v3927_v13  ;;  %758 = vmatprep.mubr.f32.mxu1 %v3708_v1 }
  0x70   : > { %884 = vmatprep.subr.mxu1 %v413_v46  ;;  %843 = vmatmul.mubr.f32.vlgmr.msra.gmra.mxu0 %v842_v51 }
  0x71   : > { %963 = vmatprep.subr.mxu0 %v3958_v29  ;;  %999 = vmatprep.mubr.f32.mxu0 %v3708_v1 }
  0x72   : > { %760 = vmatmul.mubr.f32.vlgmr.msra.gmra.mxu1 %v3929_v14  ;;  %966 = vmatpush1.msra.mxu0 %v3945_v22 }
  0x73   : > { %890 = vmatpush1.msra.mxu1 %v3984_v44  ;;  %923 = vmatprep.mubr.f32.mxu1 %v3708_v1 }
  0x74   : > { %1039 = vmatprep.subr.mxu1 %v3941_v20  ;;  %1002 = vmatmul.mubr.f32.vlgmr.msra.gmra.mxu0 %v839_v37 }
  0x75   : > { %1117 = vmatprep.subr.mxu0 %v3970_v35  ;;  %1154 = vmatprep.mubr.f32.mxu0 %v3708_v1 }
  0x76   : > { %925 = vmatmul.mubr.f32.vlgmr.msra.gmra.mxu1 %v3947_v23  ;;  %1121 = vmatpush1.msra.mxu0 %v3961_v30 }
  0x77   : > { %1041 = vmatpush1.msra.mxu1 %v3927_v13  ;;  %1074 = vmatprep.mubr.f32.mxu1 %v3708_v1 }
  0x78   : > { %1193 = vmatprep.subr.mxu1 %v3941_v20  ;;  %1156 = vmatmul.mubr.f32.vlgmr.msra.gmra.mxu0 %v3947_v23 }
  0x79   : > { %1294 = vmatprep.subr.mxu0 %v3941_v20  ;;  %1329 = vmatprep.mubr.f32.mxu0 %v3708_v1 }
  0x7a   : > { %1078 = vmatmul.mubr.f32.vlgmr.msra.gmra.mxu1 %v840_v47  ;;  %1296 = vmatpush1.msra.mxu0 %v3927_v13 }
  0x7b   : > { %1195 = vmatpush1.msra.mxu1 %v3927_v13  ;;  %1228 = vmatprep.mubr.f32.mxu1 %v3708_v1 }
  0x7c   : > { %1376 = vmatprep.subr.mxu1 %v413_v46  ;;  %1335 = vmatmul.mubr.f32.vlgmr.msra.gmra.mxu0 %v1334_v55 }
  0x7d   : > { %1455 = vmatprep.subr.mxu0 %v3958_v29  ;;  %1491 = vmatprep.mubr.f32.mxu0 %v3708_v1 }
  0x7e   : > { %1230 = vmatmul.mubr.f32.vlgmr.msra.gmra.mxu1 %v3947_v23  ;;  %1458 = vmatpush1.msra.mxu0 %v3945_v22 }
  0x7f   : > { %1382 = vmatpush1.msra.mxu1 %v3984_v44  ;;  %1415 = vmatprep.mubr.f32.mxu1 %v3708_v1 }
  0x80   : > { %1531 = vmatprep.subr.mxu1 %v3941_v20  ;;  %1494 = vmatmul.mubr.f32.vlgmr.msra.gmra.mxu0 %v4004_v52 }
  0x81   : > { %1609 = vmatprep.subr.mxu0 %v3970_v35  ;;  %1646 = vmatprep.mubr.f32.mxu0 %v3708_v1 }
  0x82   : > { %1417 = vmatmul.mubr.f32.vlgmr.msra.gmra.mxu1 %v3994_v50  ;;  %1613 = vmatpush1.msra.mxu0 %v3961_v30 }
  0x83   : > { %1533 = vmatpush1.msra.mxu1 %v3927_v13  ;;  %1566 = vmatprep.mubr.f32.mxu1 %v3708_v1 }
  0x84   : > { %1685 = vmatprep.subr.mxu1 %v3941_v20  ;;  %1648 = vmatmul.mubr.f32.vlgmr.msra.gmra.mxu0 %v3994_v50  ;;  %v4087_v20 = vld [vmem:[#allocation2 + $0xc] sm:$0xf] }
  0x85   : > { %1812 = vmatprep.mubr.f32.mxu0 %v3708_v1  ;;  %2688 = vrot.lane.b32.xlu1 %v2687_v9, %s3715_s11 }
  0x86   : > { %1570 = vmatmul.mubr.f32.vlgmr.msra.gmra.mxu1 %v1332_v53  ;;  %2636 = vrot.lane.b32.xlu0 %v2635_v10, %s3716_s3 }
  0x87   : > { %1687 = vmatpush1.msra.mxu1 %v3927_v13  ;;  %1720 = vmatprep.mubr.f32.mxu1 %v3708_v1 }
  0x8a   : > { %1722 = vmatmul.mubr.f32.vlgmr.msra.gmra.mxu1 %v3994_v50 }
  0x8b   : > { %1909 = vmatprep.mubr.f32.mxu1 %v3708_v1 }
  0xd0   : > { %v4079_v11 = vpop.permute.xlu1 %2383 }
  0xd1   : > { %v4081_v13 = vpop.permute.xlu0 %2329 }
  0xd2   : > { %v4111_v63 = vrot.slane %v4081_v13, 4 }
  0xd4   : > { %v4083_v14 = vpop.permute.xlu1 %2437 }
  0xd5   : > { %v4085_v16 = vpop.permute.xlu0 %2273 }
  0xd6   : > { %v4114_v0 = vrot.slane %v4085_v16, 4 }
  0xd8   : > { %v2585_v17 = vpop.permute.xlu1 %2584 }
  0xd9   : > { %v2531_v18 = vpop.permute.xlu0 %2530  ;;  %v4089_v21 = vrot.slane %v2585_v17, 4 }
  0xda   : > { %v4091_v22 = vrot.slane %v2531_v18, 4 }
  0xdb   : > { %v4095_v23 = vsel %vm2403_vm2, %v4089_v21, %v2585_v17  ;;  %v2591_v25 = vmul.f32 %v4089_v21, %v4087_v20 }
  0xdc   : > { %v4099_v24 = vsel %vm2457_vm3, %v4091_v22, %v2531_v18  ;;  %v2537_v26 = vmul.f32 %v4091_v22, %v4087_v20 }
  0xdd   : > { %2601 = vrot.lane.b32.xlu1 %v2591_v25, %s3709_s9 }
  0xde   : > { %2549 = vrot.lane.b32.xlu0 %v2537_v26, %s3711_s14  ;;  %v1735_v26 = vsel %vm292_vm1, %v1728_v6, 0 }
 0x123   : > { %v374_v28 = vpop.f32.mrf.mxu0 }
 0x125   : > { %v376_v29 = vpop.f32.mrf.mxu0 }
 0x127   : > { %v533_v31 = vpop.f32.mrf.mxu0 }
 0x129   : > { %v535_v34 = vpop.f32.mrf.mxu0 }
 0x12a   : > { %v456_v30 = vpop.f32.mrf.mxu1 }
 0x12b   : > { %v457_v32 = vadd.f32 %v456_v30, %v374_v28  ;;  %v1729_v28 = vld [vmem:[%s4769_s2 + $0x8] sm:$0x1]  ;;  %v4131_v30 = vsel %vm2276_vm5, %v4114_v0, %v4085_v16  ;;  %v4143_v16 = vrot.slane %v4079_v11, 4 }
 0x12c   : > { %v458_v33 = vpop.f32.mrf.mxu1  ;;  %v687_v38 = vpop.f32.mrf.mxu0 }
 0x12d   : > { %v534_v35 = vadd.f32 %v533_v31, %v457_v32  ;;  %v459_v36 = vadd.f32 %v458_v33, %v376_v29  ;;  %v4126_v29 = vsel %vm2332_vm4, %v4111_v63, %v4081_v13 }
 0x12e   : > { %v609_v37 = vpop.f32.mrf.mxu1  ;;  %v689_v42 = vpop.f32.mrf.mxu0 }
 0x12f   : > { %v536_v39 = vadd.f32 %v535_v34, %v459_v36  ;;  %v610_v40 = vadd.f32 %v609_v37, %v534_v35  ;;  %v4133_v37 = vand.u32 4294901760, %v1735_v26 }
 0x130   : > { %v611_v41 = vpop.f32.mrf.mxu1  ;;  %v844_v46 = vpop.f32.mrf.mxu0 }
 0x131   : > { %v688_v43 = vadd.f32 %v687_v38, %v610_v40  ;;  %v612_v44 = vadd.f32 %v611_v41, %v536_v39  ;;  %v1738_v38 = vsel %vm292_vm1, %v1729_v28, 0  ;;  %v2637_v28 = vpop.permute.xlu0 %2636 }
 0x132   : > { %v761_v45 = vpop.f32.mrf.mxu1  ;;  %v846_v49 = vpop.f32.mrf.mxu0 }
 0x133   : > { %v690_v47 = vadd.f32 %v689_v42, %v612_v44  ;;  %v762_v50 = vadd.f32 %v761_v45, %v688_v43  ;;  %v4146_v42 = vrot.slane %v4083_v14, 4 }
 0x134   : > { %v763_v48 = vpop.f32.mrf.mxu1  ;;  %v1003_v53 = vpop.f32.mrf.mxu0 }
 0x135   : > { %v764_v51 = vadd.f32 %v763_v48, %v690_v47 }
 0x136   : > { %v926_v52 = vpop.f32.mrf.mxu1  ;;  %v1005_v59 = vpop.f32.mrf.mxu0 }
 0x137   : > { %v4107_v54 = vcombine.low %v762_v50, %v764_v51  ;;  %v927_v55 = vadd.f32 %v926_v52, %v844_v46  ;;  %v4155_v50 = vsub.f32 %v1735_v26, %v4133_v37  ;;  %v4157_v51 = vand.u32 4294901760, %v1738_v38 }
 0x138   : > { %v928_v58 = vpop.f32.mrf.mxu1  ;;  %v1157_v5 = vpop.f32.mrf.mxu0 }
 0x139   : > { %1244 = vst [vmem:[#allocation2 + $0x4] sm:$0xff] %v4107_v54  ;;  %v1004_v60 = vadd.f32 %v1003_v53, %v927_v55  ;;  %v929_v61 = vadd.f32 %v928_v58, %v846_v49 }
 0x13a   : > { %v1079_v4 = vpop.f32.mrf.mxu1  ;;  %v1159_v17 = vpop.f32.mrf.mxu0 }
 0x13b   : > { %v1006_v8 = vadd.f32 %v1005_v59, %v929_v61  ;;  %v1080_v9 = vadd.f32 %v1079_v4, %v1004_v60  ;;  %v4165_v59 = vsel %vm2386_vm6, %v4143_v16, %v4079_v11  ;;  %v4170_v60 = vsel %vm2440_vm7, %v4146_v42, %v4083_v14 }
 0x13c   : > { %v1081_v10 = vpop.f32.mrf.mxu1  ;;  %v1336_v32 = vpop.f32.mrf.mxu0 }
 0x13d   : > { %v1158_v18 = vadd.f32 %v1157_v5, %v1080_v9  ;;  %v1082_v25 = vadd.f32 %v1081_v10, %v1006_v8  ;;  %v1815_v9 = vand.u32 4294901760, %v4155_v50  ;;  %v4176_v10 = vsub.f32 %v1738_v38, %v4157_v51 }
 0x13e   : > { %v1231_v31 = vpop.f32.mrf.mxu1  ;;  %v1338_v36 = vpop.f32.mrf.mxu0 }
 0x13f   : > { %v1160_v33 = vadd.f32 %v1159_v17, %v1082_v25  ;;  %v1232_v13 = vadd.f32 %v1231_v31, %v1158_v18 }
 0x140   : > { %v2260_v34 = vld [vmem:[#allocation2] sm:$0xff]  ;;  %v1233_v35 = vpop.f32.mrf.mxu1  ;;  %v1495_v44 = vpop.f32.mrf.mxu0  ;;  %v2261_v45 = vld [vmem:[#allocation2 + $0x8] sm:$0xf] }
 0x141   : > { %v4137_v39 = vmul.f32 %v4131_v30, %v2260_v34  ;;  %v1234_v40 = vadd.f32 %v1233_v35, %v1160_v33  ;;  %v4140_v41 = vmul.f32 %v4126_v29, %v2260_v34  ;;  %v2337_v55 = vmul.f32 %v4111_v63, %v2261_v45 }
 0x142   : > { %v1418_v43 = vpop.f32.mrf.mxu1  ;;  %v1497_v49 = vpop.f32.mrf.mxu0  ;;  %v2281_v58 = vmul.f32 %v4114_v0, %v2261_v45  ;;  %v4179_v11 = vmul.f32 %v4170_v60, %v2260_v34  ;;  %v2390_v18 = vmul.f32 %v4165_v59, %v2260_v34  ;;  %v1816_v35 = vsub.f32 %v4155_v50, %v1815_v9 }
 0x143   : > { %v4148_v46 = vcombine.low %v1232_v13, %v1234_v40  ;;  %v1419_v47 = vadd.f32 %v1418_v43, %v1336_v32  ;;  %2343 = vrot.lane.b32.xlu0 %v4140_v41, %s3716_s3  ;;  %2289 = vrot.lane.b32.xlu1 %v4137_v39, %s3715_s11  ;;  %v2391_v34 = vmul.f32 %v4143_v16, %v2261_v45  ;;  %v4197_v43 = vrot.slane %v2637_v28, 4 }
 0x144   : > { %v1420_v48 = vpop.f32.mrf.mxu1  ;;  %v1649_v4 = vpop.f32.mrf.mxu0  ;;  %v2445_v13 = vmul.f32 %v4146_v42, %v2261_v45 }
 0x145   : > { %1249 = vst [vmem:[#allocation3 + $0x4] sm:$0xff] %v4148_v46  ;;  %v1496_v52 = vadd.f32 %v1495_v44, %v1419_v47  ;;  %v1421_v53 = vadd.f32 %v1420_v48, %v1338_v36  ;;  %v1826_v36 = vand.u32 4294901760, %v4176_v10 }
 0x146   : > { %v1571_v61 = vpop.f32.mrf.mxu1  ;;  %v1651_v25 = vpop.f32.mrf.mxu0 }
 0x147   : > { %v1498_v5 = vadd.f32 %v1497_v49, %v1421_v53  ;;  %v1572_v6 = vadd.f32 %v1571_v61, %v1496_v52  ;;  %2347 = vrot.lane.b32.xlu0 %v2337_v55, %s3716_s3  ;;  %2293 = vrot.lane.b32.xlu1 %v2281_v58, %s3715_s11  ;;  %v1817_v49 = vand.u32 4294901760, %v1816_v35  ;;  %v1827_v45 = vsub.f32 %v4176_v10, %v1826_v36 }
 0x148   : > { %v1573_v8 = vpop.f32.mrf.mxu1  ;;  %v2536_v53 = vmul.f32 %v4099_v24, %v4107_v54  ;;  %v2590_v55 = vmul.f32 %v4095_v23, %v4107_v54  ;;  %v4215_v58 = vsel %vm2349_vm8, %v4197_v43, %v2637_v28  ;;  %v2396_v35 = vcombine.high %v2390_v18, %v2390_v18 }
 0x149   : > { %v1650_v17 = vadd.f32 %v1649_v4, %v1572_v6  ;;  %v1574_v14 = vadd.f32 %v1573_v8, %v1498_v5  ;;  %v1828_v6 = vand.u32 4294901760, %v1827_v45  ;;  %v2642_v8 = vmul.f32 %v4215_v58, %v4107_v54 }
 0x14a   : > { %v1723_v26 = vpop.f32.mrf.mxu1 }
 0x14b   : > { %v1652_v31 = vadd.f32 %v1651_v25, %v1574_v14  ;;  %v4182_v32 = vadd.f32 %v1723_v26, %v1650_v17  ;;  %2397 = vrot.lane.b32.xlu0 %v2390_v18, %s3713_s28  ;;  %2451 = vrot.lane.b32.xlu1 %v4179_v11, %s3714_s5  ;;  %v2342_v14 = vcombine.high %v4140_v41, %v4140_v41  ;;  %v2689_v26 = vpop.permute.xlu1 %2688 }
 0x14c   : > { %v1725_v33 = vpop.f32.mrf.mxu1  ;;  %v2544_v41 = vcombine.high %v2536_v53, %v2536_v53 }
 0x14d   : > { %v4191_v38 = vadd.f32 %v1725_v33, %v1652_v31  ;;  %v1741_v40 = vsel %vm296_vm0, %v4182_v32, 0  ;;  %v2288_v33 = vcombine.high %v4137_v39, %v4137_v39  ;;  %v2450_v39 = vcombine.high %v4179_v11, %v4179_v11 }
 0x14e   : > { %v4199_v44 = vand.u32 4294901760, %v1741_v40  ;;  %v2596_v11 = vcombine.high %v2590_v55, %v2590_v55 }
 0x14f   : > { %2401 = vrot.lane.b32.xlu0 %v2391_v34, %s3713_s28  ;;  %2455 = vrot.lane.b32.xlu1 %v2445_v13, %s3714_s5  ;;  %v1744_v47 = vsel %vm296_vm0, %v4191_v38, 0  ;;  %v4230_v34 = vrot.slane %v2689_v26, 4 }
 0x150   : > { %v1776_v48 = vand.u32 4294901760, %v1744_v47  ;;  %v1872_v52 = vsub.f32 %v1741_v40, %v4199_v44  ;;  %v2643_v40 = vmul.f32 %v4197_v43, %v4087_v20 }
 0x151   : > { %v4241_v18 = vsel %vm2295_vm9, %v4230_v34, %v2689_v26 }
 0x152   : > { %1777 = vmatprep.subr.mxu0 %v1776_v48  ;;  %v1866_v61 = vsub.f32 %v1744_v47, %v1776_v48  ;;  %v1873_v4 = vand.u32 4294901760, %v1872_v52  ;;  %v2694_v13 = vmul.f32 %v4241_v18, %v4107_v54  ;;  %v2648_v47 = vcombine.high %v2642_v8, %v2642_v8 }
 0x153   : > { %1779 = vmatpush1.msra.mxu0 %v4199_v44  ;;  %2545 = vrot.lane.b32.xlu0 %v2536_v53, %s3711_s14 }
 0x154   : > { %2597 = vrot.lane.b32.xlu1 %v2590_v55, %s3709_s9  ;;  %1818 = vmatmul.mubr.f32.vlgmr.msra.gmra.mxu0 %v1817_v49  ;;  %v1867_v5 = vand.u32 4294901760, %v1866_v61  ;;  %v1874_v17 = vsub.f32 %v1872_v52, %v1873_v4 }
 0x155   : > { %1956 = vmatprep.subr.mxu0 %v1866_v61  ;;  %1823 = vmatprep.mubr.f32.mxu0 %v3708_v1 }
 0x156   : > { %1959 = vmatpush1.msra.mxu0 %v1872_v52  ;;  %v1868_v25 = vsub.f32 %v1866_v61, %v1867_v5  ;;  %v1875_v31 = vand.u32 4294901760, %v1874_v17  ;;  %v2283_v52 = vld [vmem:[#allocation3 + $0x8] sm:$0xf]  ;;  %v4320_v61 = vpop.permute.xlu1 %2601 }
 0x157   : > { %2127 = vmatprep.subr.mxu0 %v1867_v5  ;;  %2649 = vrot.lane.b32.xlu0 %v2642_v8, %s3710_s13 }
 0x158   : > { %2345 = vrot.lane.b32.xlu1 %v2342_v14, %s3716_s3  ;;  %1829 = vmatmul.mubr.f32.gmra.mxu0 %v1828_v6  ;;  %v1869_v28 = vand.u32 4294901760, %v1868_v25  ;;  %v4323_v25 = vsub.s32 4, %v3909_v2 }
 0x159   : > { %1992 = vmatprep.mubr.f32.mxu0 %v3708_v1 }
 0x15a   : > { %1870 = vmatprep.subr.mxu1 %v1869_v28 }
 0x15b   : > { %1876 = vmatpush1.msra.mxu1 %v1875_v31  ;;  %2291 = vrot.lane.b32.xlu0 %v2288_v33, %s3715_s11  ;;  %v2484_v31 = vrot.slane %v3925_v12, %v4323_v25  ;;  %v2488_v33 = vrot.slane %v3931_v15, %v4323_v25 }
 0x15c   : > { %2399 = vrot.lane.b32.xlu1 %v2396_v35, %s3713_s28  ;;  %1911 = vmatmul.mubr.f32.vlgmr.msra.gmra.mxu1 %v4133_v37 }
 0x15d   : > { %1995 = vmatmul.mubr.f32.vlgmr.msra.gmra.mxu0 %v4155_v50  ;;  %2040 = vmatprep.subr.mxu1 %v1776_v48  ;;  %v2539_v50 = vld [vmem:[#allocation3 + $0xc] sm:$0xf] }
 0x15e   : > { %2131 = vmatpush1.msra.mxu0 %v1873_v4  ;;  %2042 = vmatpush1.msra.mxu1 %v4199_v44  ;;  %v2541_v49 = vmul.f32 %v2539_v50, %v4091_v22 }
 0x15f   : > { %2210 = vmatprep.subr.mxu1 %v1776_v48  ;;  %1916 = vmatprep.mubr.f32.mxu1 %v3708_v1  ;;  %v2695_v48 = vmul.f32 %v4230_v34, %v4087_v20  ;;  %v2282_v20 = vld [vmem:[#allocation3] sm:$0xff] }
 0x160   : > { %2547 = vrot.lane.b32.xlu1 %v2544_v41, %s3711_s14  ;;  %2453 = vrot.lane.b32.xlu0 %v2450_v39, %s3714_s5  ;;  %v2446_v22 = vmul.f32 %v4170_v60, %v2282_v20  ;;  %v2645_v60 = vmul.f32 %v4197_v43, %v2539_v50  ;;  %v2550_v43 = vpop.permute.xlu0 %2549 }
 0x161   : > { %1918 = vmatmul.mubr.f32.gmra.mxu1 %v4157_v51  ;;  %2000 = vmatprep.mubr.f32.mxu0 %v3708_v1 }
 0x162   : > { %2003 = vmatmul.mubr.f32.gmra.mxu0 %v4176_v10  ;;  %2075 = vmatprep.mubr.f32.mxu1 %v3708_v1  ;;  %v2338_v10 = vmul.f32 %v4126_v29, %v2282_v20  ;;  %v2447_v29 = vmul.f32 %v4146_v42, %v2283_v52  ;;  %v2644_v42 = vmul.f32 %v4215_v58, %v4148_v46 }
 0x163   : > { %2164 = vmatprep.mubr.f32.mxu0 %v3708_v1 }
 0x164   : > { %2701 = vrot.lane.b32.xlu1 %v2694_v13, %s3712_s26  ;;  %2599 = vrot.lane.b32.xlu0 %v2596_v11, %s3709_s9  ;;  %v3150_v53 = vcombine.high %v2644_v42, %v2644_v42 }
 0x165   : > { %2079 = vmatmul.mubr.f32.vlgmr.msra.gmra.mxu1 %v1815_v9  ;;  %v2700_v9 = vcombine.high %v2694_v13, %v2694_v13 }
 0x166   : > { %2212 = vmatpush1.msra.mxu1 %v4199_v44  ;;  %2166 = vmatmul.mubr.f32.vlgmr.msra.gmra.mxu0 %v4133_v37  ;;  %v2593_v44 = vmul.f32 %v4089_v21, %v2539_v50  ;;  %v2339_v21 = vmul.f32 %v4111_v63, %v2283_v52  ;;  %v2592_v63 = vmul.f32 %v4095_v23, %v4148_v46 }
 0x167   : > { %2084 = vmatprep.mubr.f32.mxu1 %v3708_v1  ;;  %2171 = vmatprep.mubr.f32.mxu0 %v3708_v1  ;;  %v2696_v23 = vmul.f32 %v4241_v18, %v4148_v46 }
 0x168   : > { %2651 = vrot.lane.b32.xlu1 %v2648_v47, %s3710_s13  ;;  %2653 = vrot.lane.b32.xlu0 %v2643_v40, %s3710_s13  ;;  %v3119_v55 = vcombine.high %v2592_v63, %v2592_v63 }
 0x169   : > { %2088 = vmatmul.mubr.f32.gmra.mxu1 %v1826_v36  ;;  %v2284_v36 = vmul.f32 %v2282_v20, %v4131_v30  ;;  %v2393_v30 = vmul.f32 %v4143_v16, %v2283_v52  ;;  %v3177_v58 = vcombine.high %v2696_v23, %v2696_v23 }
 0x16a   : > { %2173 = vmatmul.mubr.f32.gmra.mxu0 %v4157_v51  ;;  %2245 = vmatprep.mubr.f32.mxu1 %v3708_v1 }
 0x16c   : > { %2705 = vrot.lane.b32.xlu1 %v2695_v48, %s3712_s26  ;;  %2703 = vrot.lane.b32.xlu0 %v2700_v9, %s3712_s26 }
 0x16d   : > { %2247 = vmatmul.mubr.f32.vlgmr.msra.gmra.mxu1 %v4133_v37  ;;  %v2392_v37 = vmul.f32 %v4165_v59, %v2282_v20  ;;  %v2974_v59 = vcombine.high %v2338_v10, %v2338_v10 }
 0x16e   : > { %2252 = vmatprep.mubr.f32.mxu1 %v3708_v1  ;;  %v2285_v1 = vmul.f32 %v2283_v52, %v4114_v0  ;;  %v2540_v0 = vmul.f32 %v4099_v24, %v4148_v46  ;;  %v3036_v24 = vcombine.high %v2446_v22, %v2446_v22  ;;  %v2697_v46 = vmul.f32 %v4230_v34, %v2539_v50 }
 0x16f   : > { %v3005_v16 = vcombine.high %v2392_v37, %v2392_v37  ;;  %v4329_v34 = vcombine.low %v2484_v31, %v2488_v33 }
 0x170   : > { %3124 = vrot.lane.b32.xlu1 %v2593_v44, %s3709_s9  ;;  %3093 = vrot.lane.b32.xlu0 %v2541_v49, %s3711_s14  ;;  %v3088_v45 = vcombine.high %v2540_v0, %v2540_v0 }
 0x171   : > { %2254 = vmatmul.mubr.f32.gmra.mxu1 %v4157_v51  ;;  %v2943_v51 = vcombine.high %v2284_v36, %v2284_v36  ;;  %v2493_v39 = vmul.f32 %v4329_v34, %v4107_v54 }
 0x173   : > { %v2497_v2 = vcombine.high %v2493_v39, %v2493_v39  ;;  %v2499_v11 = vmul.f32 %v2493_v39, %v4182_v32 }
 0x174   : > { %2975 = vrot.lane.b32.xlu1 %v2338_v10, %s3716_s3  ;;  %2944 = vrot.lane.b32.xlu0 %v2284_v36, %s3715_s11 }
 0x175   : > { %v2500_v40 = vmul.f32 %v2497_v2, %v4191_v38  ;;  %v2501_v48 = vsel %vm296_vm0, %v2499_v11, 0.0 }
 0x176   : > { %v2502_v49 = vrot.slane %v2501_v48, 4 }
 0x177   : > { %v2508_v9 = vsel %vm296_vm0, %v2500_v40, 0.0 }
 0x178   : > { %2979 = vrot.lane.b32.xlu1 %v2339_v21, %s3716_s3  ;;  %2948 = vrot.lane.b32.xlu0 %v2285_v1, %s3715_s11  ;;  %v2509_v20 = vrot.slane %v2508_v9, 4 }
 0x17c   : > { %3037 = vrot.lane.b32.xlu1 %v2446_v22, %s3714_s5  ;;  %3006 = vrot.lane.b32.xlu0 %v2392_v37, %s3713_s28  ;;  %v2503_v22 = vadd.f32 %v2502_v49, %v2501_v48  ;;  %v2510_v37 = vadd.f32 %v2509_v20, %v2508_v9 }
 0x180   : > { %3041 = vrot.lane.b32.xlu1 %v2447_v29, %s3714_s5  ;;  %3010 = vrot.lane.b32.xlu0 %v2393_v30, %s3713_s28 }
 0x184   : > { %3120 = vrot.lane.b32.xlu1 %v2592_v63, %s3709_s9  ;;  %3089 = vrot.lane.b32.xlu0 %v2540_v0, %s3711_s14 }
 0x188   : > { %2946 = vrot.lane.b32.xlu1 %v2943_v51, %s3715_s11  ;;  %3151 = vrot.lane.b32.xlu0 %v2644_v42, %s3710_s13  ;;  %s3717_s11 = smov [#allocation9]  }
 0x18c   : > { %3008 = vrot.lane.b32.xlu1 %v3005_v16, %s3713_s28  ;;  %2977 = vrot.lane.b32.xlu0 %v2974_v59, %s3716_s3  ;;  %v2504_v59 = vrot.slane %v2503_v22, 2  ;;  %s3198_s28 = scalar_lea.sflag [#allocation6], %s273_s12  ;;  %s3579_s3 = sshll.u32 %s3717_s11, 4  ;;  %s3580_s3 = int_to_ptr.vmem [resolvable:$false] %s3579_s3 }
 0x18d   : > { %s3581_s4 = scalar_lea.vmem %s3580_s3, 256  ;;  %p3582_p1 = scmp.lt.s32.totalorder %s3217_s8, %s3580_s3 }
 0x190   : > { %3178 = vrot.lane.b32.xlu1 %v2696_v23, %s3712_s26  ;;  %3039 = vrot.lane.b32.xlu0 %v3036_v24, %s3714_s5  ;;  %s3575_s5 = scalar_lea.vmem %s3217_s8, 128 }
 0x191   : > { %p3576_p3 = scmp.ne.s32.totalorder %s3217_s8, %s3575_s5  ;;  %p3583_p2 = scmp.lt.s32.totalorder %s3581_s4, %s3575_s5 }
 0x193   : > { %p3577_p12 = pnand %p3576_p3, %p4821_p10  ;;  %p3584_p5 = por %p3583_p2, %p3582_p1 }
 0x194   : > { %3091 = vrot.lane.b32.xlu1 %v3088_v45, %s3711_s14  ;;  %3155 = vrot.lane.b32.xlu0 %v2645_v60, %s3710_s13  ;;  %v2511_v45 = vrot.slane %v2510_v37, 2  ;;  %s4820_s14 = sld [smem:[#allocation24_spill]] }
 0x195   : > { %p3578_p0 = pneg %p3577_p12 }
 0x197   : > { %p3585_p8 = pnand %p3584_p5, %p3578_p0 }
 0x198   : > { %3153 = vrot.lane.b32.xlu1 %v3150_v53, %s3710_s13  ;;  %3122 = vrot.lane.b32.xlu0 %v3119_v55, %s3709_s9 }
 0x19c   : > { %3182 = vrot.lane.b32.xlu1 %v2697_v46, %s3712_s26  ;;  %3180 = vrot.lane.b32.xlu0 %v3177_v58, %s3712_s26  ;;  %s3214_s26 = scalar_lea.hbm %s4820_s14, %s3347_s21 }
 0x1b5   : > { %v2290_v4 = vpop.permute.xlu1 %2289  ;;  %v2344_v5 = vpop.permute.xlu0 %2343 }
 0x1b9   : > { %v2294_v6 = vpop.permute.xlu1 %2293  ;;  %v2348_v8 = vpop.permute.xlu0 %2347 }
 0x1bd   : > { %v2452_v17 = vpop.permute.xlu1 %2451  ;;  %v2398_v14 = vpop.permute.xlu0 %2397 }
 0x1c1   : > { %v2456_v26 = vpop.permute.xlu1 %2455  ;;  %v2402_v28 = vpop.permute.xlu0 %2401 }
 0x1c5   : > { %v2546_v41 = vpop.permute.xlu0 %2545 }
 0x1c6   : > { %v2598_v35 = vpop.permute.xlu1 %2597 }
 0x1c9   : > { %v4333_v13 = vpop.permute.xlu0 %2649 }
 0x1ca   : > { %v2346_v18 = vpop.permute.xlu1 %2345 }
 0x1cb   : > { %v2350_v12 = vsel %vm2349_vm8, %v2344_v5, %v2346_v18  ;;  %v2351_v15 = vsel %vm2349_vm8, %v2346_v18, %v2348_v8 }
 0x1cc   : > { %v2354_v54 = vmul.f32 %v2350_v12, %v4182_v32  ;;  %v2355_v44 = vmul.f32 %v2351_v15, %v4191_v38 }
 0x1cd   : > { %v2292_v50 = vpop.permute.xlu0 %2291 }
 0x1ce   : > { %v2400_v47 = vpop.permute.xlu1 %2399  ;;  %v2356_v36 = vsel %vm296_vm0, %v2354_v54, 0.0  ;;  %v2363_v21 = vsel %vm296_vm0, %v2355_v44, 0.0  ;;  %v2296_v0 = vsel %vm2295_vm9, %v2290_v4, %v2292_v50  ;;  %v2297_v42 = vsel %vm2295_vm9, %v2292_v50, %v2294_v6 }
 0x1cf   : > { %v2404_v52 = vsel %vm2403_vm2, %v2398_v14, %v2400_v47  ;;  %v2357_v29 = vrot.slane %v2356_v36, 4  ;;  %v2405_v30 = vsel %vm2403_vm2, %v2400_v47, %v2402_v28  ;;  %v2364_v51 = vrot.slane %v2363_v21, 4 }
 0x1d0   : > { %v2408_v63 = vmul.f32 %v2404_v52, %v4182_v32  ;;  %v2409_v23 = vmul.f32 %v2405_v30, %v4191_v38  ;;  %v2300_v24 = vmul.f32 %v2296_v0, %v4182_v32  ;;  %v2301_v46 = vmul.f32 %v2297_v42, %v4191_v38 }
 0x1d1   : > { %v2358_v53 = vadd.f32 %v2357_v29, %v2356_v36  ;;  %v2365_v4 = vadd.f32 %v2364_v51, %v2363_v21  ;;  %v2505_v14 = vadd.f32 %v2504_v59, %v2503_v22 }
 0x1d2   : > { %v2548_v10 = vpop.permute.xlu1 %2547  ;;  %v2454_v1 = vpop.permute.xlu0 %2453  ;;  %v2410_v55 = vsel %vm296_vm0, %v2408_v63, 0.0  ;;  %v2417_v31 = vsel %vm296_vm0, %v2409_v23, 0.0  ;;  %v2302_v33 = vsel %vm296_vm0, %v2300_v24, 0.0  ;;  %v2309_v18 = vsel %vm296_vm0, %v2301_v46, 0.0 }
 0x1d3   : > { %v2551_v60 = vsel %vm2440_vm7, %v2546_v41, %v2548_v10  ;;  %v2552_v5 = vsel %vm2440_vm7, %v2548_v10, %v2550_v43  ;;  %v2458_v8 = vsel %vm2457_vm3, %v2452_v17, %v2454_v1  ;;  %v2411_v28 = vrot.slane %v2410_v55, 4 }
 0x1d4   : > { %v2555_v6 = vmul.f32 %v2551_v60, %v4182_v32  ;;  %v2512_v41 = vadd.f32 %v2511_v45, %v2510_v37  ;;  %v2359_v39 = vrot.slane %v2358_v53, 2  ;;  %v2556_v2 = vmul.f32 %v2552_v5, %v4191_v38 }
 0x1d5   : > { %v2459_v11 = vsel %vm2457_vm3, %v2454_v1, %v2456_v26  ;;  %v2366_v12 = vrot.slane %v2365_v4, 2  ;;  %v2462_v17 = vmul.f32 %v2458_v8, %v4182_v32  ;;  %v2418_v48 = vrot.slane %v2417_v31, 4 }
 0x1d6   : > { %v4350_v16 = vpop.permute.xlu1 %2701  ;;  %v2600_v58 = vpop.permute.xlu0 %2599  ;;  %v2303_v50 = vrot.slane %v2302_v33, 4  ;;  %v2557_v9 = vsel %vm296_vm0, %v2555_v6, 0.0  ;;  %v2506_v49 = vrot.slane %v2505_v14, 1  ;;  %v2412_v26 = vadd.f32 %v2411_v28, %v2410_v55 }
 0x1d7   : > { %v2603_v47 = vsel %vm2386_vm6, %v2598_v35, %v2600_v58  ;;  %v2604_v15 = vsel %vm2386_vm6, %v2600_v58, %v4320_v61  ;;  %v2310_v20 = vrot.slane %v2309_v18, 4  ;;  %v2463_v10 = vmul.f32 %v2459_v11, %v4191_v38 }
 0x1d8   : > { %v2564_v35 = vsel %vm296_vm0, %v2556_v2, 0.0  ;;  %v2607_v52 = vmul.f32 %v2603_v47, %v4182_v32  ;;  %v2608_v61 = vmul.f32 %v2604_v15, %v4191_v38  ;;  %v2513_v1 = vrot.slane %v2512_v41, 1 }
 0x1d9   : > { %v2360_v22 = vadd.f32 %v2359_v39, %v2358_v53  ;;  %v2367_v37 = vadd.f32 %v2366_v12, %v2365_v4  ;;  %v2558_v29 = vrot.slane %v2557_v9, 4  ;;  %v2464_v30 = vsel %vm296_vm0, %v2462_v17, 0.0 }
 0x1da   : > { %v2652_v40 = vpop.permute.xlu1 %2651  ;;  %v2654_v54 = vpop.permute.xlu0 %2653  ;;  %v2419_v63 = vadd.f32 %v2418_v48, %v2417_v31  ;;  %v2304_v0 = vadd.f32 %v2303_v50, %v2302_v33  ;;  %v2413_v59 = vrot.slane %v2412_v26, 2  ;;  %v2311_v23 = vadd.f32 %v2310_v20, %v2309_v18 }
 0x1db   : > { %v2655_v36 = vsel %vm2332_vm4, %v4333_v13, %v2652_v40  ;;  %v4386_v13 = vadd.f32 %v2506_v49, %v2505_v14  ;;  %v2565_v24 = vrot.slane %v2564_v35, 4  ;;  %v2471_v60 = vsel %vm296_vm0, %v2463_v10, 0.0 }
 0x1dc   : > { %v2659_v51 = vmul.f32 %v2655_v36, %v4182_v32  ;;  %v2465_v45 = vrot.slane %v2464_v30, 4  ;;  %v2609_v53 = vsel %vm296_vm0, %v2607_v52, 0.0  ;;  %v2616_v55 = vsel %vm296_vm0, %v2608_v61, 0.0 }
 0x1dd   : > { %v2656_v46 = vsel %vm2332_vm4, %v2652_v40, %v2654_v54  ;;  %v2361_v5 = vrot.slane %v2360_v22, 1  ;;  %v2368_v6 = vrot.slane %v2367_v37, 1  ;;  %v2559_v8 = vadd.f32 %v2558_v29, %v2557_v9 }
 0x1de   : > { %v2704_v58 = vpop.permute.xlu0 %2703  ;;  %v4392_v14 = vadd.f32 %v2513_v1, %v2512_v41  ;;  %v2420_v31 = vrot.slane %v2419_v63, 2  ;;  %v2305_v33 = vrot.slane %v2304_v0, 2  ;;  %v2472_v39 = vrot.slane %v2471_v60, 4  ;;  %v2706_v61 = vpop.permute.xlu1 %2705 }
 0x1df   : > { %v2661_v18 = vsel %vm296_vm0, %v2659_v51, 0.0  ;;  %v2610_v11 = vrot.slane %v2609_v53, 4  ;;  %v2617_v12 = vrot.slane %v2616_v55, 4  ;;  %v2660_v17 = vmul.f32 %v2656_v46, %v4191_v38 }
 0x1e0   : > { %v2707_v40 = vsel %vm2276_vm5, %v4350_v16, %v2704_v58  ;;  %v2414_v15 = vadd.f32 %v2413_v59, %v2412_v26  ;;  %v2312_v48 = vrot.slane %v2311_v23, 2  ;;  %v2566_v50 = vadd.f32 %v2565_v24, %v2564_v35 }
 0x1e1   : > { %v2466_v9 = vadd.f32 %v2465_v45, %v2464_v30  ;;  %v4398_v41 = vadd.f32 %v2361_v5, %v2360_v22  ;;  %v4400_v54 = vadd.f32 %v2368_v6, %v2367_v37  ;;  %v2560_v49 = vrot.slane %v2559_v8, 2 }
 0x1e2   : > { %v2662_v20 = vrot.slane %v2661_v18, 4  ;;  %v2421_v36 = vadd.f32 %v2420_v31, %v2419_v63  ;;  %v2473_v52 = vadd.f32 %v2472_v39, %v2471_v60  ;;  %v2711_v1 = vmul.f32 %v2707_v40, %v4182_v32 }
 0x1e3   : > { %v2306_v26 = vadd.f32 %v2305_v33, %v2304_v0  ;;  %v2611_v35 = vadd.f32 %v2610_v11, %v2609_v53  ;;  %v2618_v30 = vadd.f32 %v2617_v12, %v2616_v55  ;;  %v2668_v22 = vsel %vm296_vm0, %v2660_v17, 0.0 }
 0x1e4   : > { %v2415_v51 = vrot.slane %v2414_v15, 1  ;;  %v2313_v59 = vadd.f32 %v2312_v48, %v2311_v23  ;;  %v2567_v24 = vrot.slane %v2566_v50, 2  ;;  %v2467_v45 = vrot.slane %v2466_v9, 2 }
 0x1e5   : > { %v2561_v60 = vadd.f32 %v2560_v49, %v2559_v8  ;;  %v2663_v46 = vadd.f32 %v2662_v20, %v2661_v18  ;;  %v2708_v32 = vsel %vm2276_vm5, %v2704_v58, %v2706_v61  ;;  %v2474_v0 = vrot.slane %v2473_v52, 2 }
 0x1e6   : > { %v2669_v53 = vrot.slane %v2668_v22, 4  ;;  %v2713_v55 = vsel %vm296_vm0, %v2711_v1, 0.0  ;;  %v2422_v6 = vrot.slane %v2421_v36, 1  ;;  %v2307_v31 = vrot.slane %v2306_v26, 1 }
 0x1e7   : > { %v2612_v33 = vrot.slane %v2611_v35, 2  ;;  %v2619_v23 = vrot.slane %v2618_v30, 2  ;;  %v2314_v11 = vrot.slane %v2313_v59, 1  ;;  %v2468_v12 = vadd.f32 %v2467_v45, %v2466_v9 }
 0x1e8   : > { %v2712_v8 = vmul.f32 %v2708_v32, %v4191_v38  ;;  %v2568_v58 = vadd.f32 %v2567_v24, %v2566_v50  ;;  %v2664_v40 = vrot.slane %v2663_v46, 2  ;;  %v2416_v49 = vadd.f32 %v2415_v51, %v2414_v15 }
 0x1e9   : > { %v2562_v20 = vrot.slane %v2561_v60, 1  ;;  %v2475_v61 = vadd.f32 %v2474_v0, %v2473_v52  ;;  %v2423_v1 = vadd.f32 %v2422_v6, %v2421_v36  ;;  %v2620_v62 = vadd.f32 %v2619_v23, %v2618_v30 }
 0x1ea   : > { %v2308_v9 = vadd.f32 %v2307_v31, %v2306_v26  ;;  %v2469_v45 = vrot.slane %v2468_v12, 1  ;;  %v2720_v38 = vsel %vm296_vm0, %v2712_v8, 0.0  ;;  %v2315_v24 = vadd.f32 %v2314_v11, %v2313_v59 }
 0x1eb   : > { %v2563_v51 = vadd.f32 %v2562_v20, %v2561_v60  ;;  %v2476_v52 = vrot.slane %v2475_v61, 1  ;;  %v2621_v30 = vrot.slane %v2620_v62, 1  ;;  %v2721_v0 = vrot.slane %v2720_v38, 4 }
 0x1ec   : > { %v2470_v26 = vadd.f32 %v2469_v45, %v2468_v12 }
 0x1ed   : > { %v2477_v23 = vadd.f32 %v2476_v52, %v2475_v61  ;;  %v2622_v8 = vadd.f32 %v2621_v30, %v2620_v62 }
 0x214   : > { %v4365_v43 = vpop.f32.mrf.mxu0 }
 0x216   : > { %v4372_v44 = vpop.f32.mrf.mxu0 }
 0x218   : > { %v4380_v21 = vpop.f32.mrf.mxu0 }
 0x21a   : > { %v4384_v42 = vpop.f32.mrf.mxu0 }
 0x21c   : > { %v1912_v4 = vpop.f32.mrf.mxu1 }
 0x21d   : > { %v1996_v28 = vpop.f32.mrf.mxu0  ;;  %v1913_v16 = vadd.f32 %v1912_v4, %v4365_v43 }
 0x21e   : > { %v1914_v2 = vpop.f32.mrf.mxu1 }
 0x21f   : > { %v1998_v47 = vpop.f32.mrf.mxu0  ;;  %v1915_v43 = vadd.f32 %v1914_v2, %v4372_v44  ;;  %v1997_v5 = vadd.f32 %v1996_v28, %v1913_v16  ;;  %v2714_v44 = vrot.slane %v2713_v55, 4  ;;  %v2670_v28 = vadd.f32 %v2669_v53, %v2668_v22 }
 0x220   : > { %v2613_v16 = vadd.f32 %v2612_v33, %v2611_v35 }
 0x221   : > { %v4402_v10 = vpop.f32.mrf.mxu1  ;;  %v1999_v2 = vadd.f32 %v1998_v47, %v1915_v43  ;;  %v2665_v47 = vadd.f32 %v2664_v40, %v2663_v46  ;;  %v2715_v43 = vadd.f32 %v2714_v44, %v2713_v55  ;;  %v2671_v22 = vrot.slane %v2670_v28, 2 }
 0x222   : > { %v4406_v29 = vpop.f32.mrf.mxu0  ;;  %v2614_v35 = vrot.slane %v2613_v16, 1  ;;  %v1920_v6 = vadd.f32 %v4402_v10, %v4380_v21  ;;  %v2722_v10 = vadd.f32 %v2721_v0, %v2720_v38 }
 0x223   : > { %v4409_v37 = vpop.f32.mrf.mxu1  ;;  %v2666_v55 = vrot.slane %v2665_v47, 1  ;;  %v2716_v60 = vrot.slane %v2715_v43, 2  ;;  %v2672_v21 = vadd.f32 %v2671_v22, %v2670_v28 }
 0x224   : > { %v4411_v63 = vpop.f32.mrf.mxu0  ;;  %v2615_v12 = vadd.f32 %v2614_v35, %v2613_v16  ;;  %v1922_v61 = vadd.f32 %v4409_v37, %v4384_v42 }
 0x225   : > { %v2080_v4 = vpop.f32.mrf.mxu1  ;;  %v2667_v40 = vadd.f32 %v2666_v55, %v2665_v47  ;;  %v2717_v44 = vadd.f32 %v2716_v60, %v2715_v43  ;;  %v2673_v30 = vrot.slane %v2672_v21, 1 }
 0x226   : > { %v2081_v18 = vadd.f32 %v2080_v4, %v1997_v5  ;;  %v2167_v17 = vpop.f32.mrf.mxu0  ;;  %v2569_v4 = vrot.slane %v2568_v58, 1 }
 0x227   : > { %v2082_v39 = vpop.f32.mrf.mxu1 }
 0x228   : > { %v2083_v56 = vadd.f32 %v2082_v39, %v1999_v2  ;;  %v2168_v32 = vadd.f32 %v2167_v17, %v2081_v18  ;;  %v2169_v50 = vpop.f32.mrf.mxu0  ;;  %v2570_v46 = vadd.f32 %v2569_v4, %v2568_v58 }
 0x229   : > { %v2089_v48 = vpop.f32.mrf.mxu1 }
 0x22a   : > { %v2170_v53 = vadd.f32 %v2169_v50, %v2083_v56  ;;  %v2174_v28 = vpop.f32.mrf.mxu0  ;;  %v2718_v50 = vrot.slane %v2717_v44, 1 }
 0x22b   : > { %v4417_v57 = vpop.f32.mrf.mxu1 }
 0x22c   : > { %v2719_v55 = vadd.f32 %v2718_v50, %v2717_v44 }
 0x22d   : > { %v2248_v15 = vpop.f32.mrf.mxu1 }
 0x22e   : > { %v2249_v36 = vadd.f32 %v2248_v15, %v2168_v32 }
 0x22f   : > { %v2250_v5 = vpop.f32.mrf.mxu1 }
 0x230   : > { %v4423_v31 = vadd.f32 %v4398_v41, %v2249_v36  ;;  %v4425_v59 = vadd.f32 %v2416_v49, %v2249_v36  ;;  %v4427_v33 = vadd.f32 %v2250_v5, %v2170_v53  ;;  %v4429_v39 = vadd.f32 %v2308_v9, %v2249_v36 }
 0x231   : > { %v4431_v11 = vadd.f32 %v2470_v26, %v2249_v36  ;;  %v2005_v41 = vadd.f32 %v4406_v29, %v1920_v6  ;;  %v4436_v18 = vadd.f32 %v4386_v13, %v2249_v36  ;;  %v4447_v20 = vadd.f32 %v2563_v51, %v2249_v36  ;;  %v2255_v32 = vpop.f32.mrf.mxu1 }
 0x232   : > { %v2731_v56 = vrot.slane %v4423_v31, 1  ;;  %v2739_v58 = vrot.slane %v4425_v59, 2  ;;  %v4442_v2 = vadd.f32 %v4400_v54, %v4427_v33  ;;  %v4445_v49 = vadd.f32 %v2423_v1, %v4427_v33 }
 0x233   : > { %v2090_v62 = vadd.f32 %v2089_v48, %v2005_v41  ;;  %v2747_v13 = vrot.slane %v4431_v11, 3  ;;  %v4453_v16 = vadd.f32 %v2315_v24, %v4427_v33  ;;  %v4456_v9 = vadd.f32 %v2477_v23, %v4427_v33 }
 0x234   : > { %v2735_v17 = vmax.f32 %v4429_v39, %v2731_v56  ;;  %v2732_v54 = vrot.slane %v4442_v2, 1  ;;  %v2723_v1 = vrot.slane %v2722_v10, 2  ;;  %v4459_v45 = vadd.f32 %v2615_v12, %v2249_v36 }
 0x235   : > { %v2755_v38 = vrot.slane %v4436_v18, 4  ;;  %v4464_v42 = vadd.f32 %v4392_v14, %v4427_v33  ;;  %v2740_v24 = vrot.slane %v4445_v49, 2  ;;  %v2175_v4 = vadd.f32 %v2174_v28, %v2090_v62 }
 0x236   : > { %v2743_v29 = vmax.f32 %v2735_v17, %v2739_v58  ;;  %v2736_v37 = vmax.f32 %v4453_v16, %v2732_v54  ;;  %v2675_v47 = vadd.f32 %v2667_v40, %v2249_v36  ;;  %v2763_v15 = vrot.slane %v4447_v20, 5  ;;  %v2257_v58 = vpop.f32.mrf.mxu1 }
 0x237   : > { %v2007_v51 = vadd.f32 %v4411_v63, %v1922_v61  ;;  %v4471_v52 = vadd.f32 %v2570_v46, %v4427_v33  ;;  %v2748_v35 = vrot.slane %v4456_v9, 3  ;;  %v2256_v14 = vadd.f32 %v2255_v32, %v2175_v4  ;;  %v2176_v63 = vpop.f32.mrf.mxu0 }
 0x238   : > { %v2751_v48 = vmax.f32 %v2743_v29, %v2747_v13  ;;  %v2744_v22 = vmax.f32 %v2736_v37, %v2740_v24  ;;  %v2771_v53 = vrot.slane %v4459_v45, 6  ;;  %v4477_v36 = vadd.f32 %v2622_v8, %v4427_v33  ;;  %v4485_v8 = vpop.permute.xlu0 %3093 }
 0x239   : > { %v2092_v5 = vadd.f32 %v4417_v57, %v2007_v51  ;;  %v2756_v6 = vrot.slane %v4464_v42, 4  ;;  %v2779_v60 = vrot.slane %v2675_v47, 7  ;;  %v2724_v23 = vadd.f32 %v2723_v1, %v2722_v10  ;;  %v4483_v57 = vpop.permute.xlu1 %3124 }
 0x23a   : > { %v2759_v43 = vmax.f32 %v2751_v48, %v2755_v38  ;;  %v2752_v26 = vmax.f32 %v2744_v22, %v2748_v35  ;;  %v2764_v12 = vrot.slane %v4471_v52, 5  ;;  %v4481_v41 = vadd.f32 %v2719_v55, %v2256_v14 }
 0x23b   : > { %v2674_v40 = vadd.f32 %v2673_v30, %v2672_v21  ;;  %v2177_v62 = vadd.f32 %v2176_v63, %v2092_v5  ;;  %v2772_v13 = vrot.slane %v4477_v36, 6  ;;  %v2725_v28 = vrot.slane %v2724_v23, 1 }
 0x23c   : > { %v2767_v0 = vmax.f32 %v2759_v43, %v2763_v15  ;;  %v2760_v56 = vmax.f32 %v2752_v26, %v2756_v6  ;;  %v4508_v51 = vpop.permute.xlu0 %2944 }
 0x23d   : > { %v2258_v10 = vadd.f32 %v2257_v58, %v2177_v62  ;;  %v4492_v61 = vadd.f32 %v2674_v40, %v4427_v33  ;;  %v4506_v15 = vpop.permute.xlu1 %2975  ;;  %v2726_v30 = vadd.f32 %v2725_v28, %v2724_v23 }
 0x23e   : > { %v2775_v46 = vmax.f32 %v2767_v0, %v2771_v53  ;;  %v2768_v29 = vmax.f32 %v2760_v56, %v2764_v12 }
 0x23f   : > { %v2780_v14 = vrot.slane %v4492_v61, 7  ;;  %v4514_v26 = vadd.f32 %v2726_v30, %v2258_v10 }
 0x240   : > { %v2783_v17 = vmax.f32 %v2775_v46, %v2779_v60  ;;  %v2776_v54 = vmax.f32 %v2768_v29, %v2772_v13  ;;  %v4521_v46 = vpop.permute.xlu0 %2948 }
 0x241   : > { %v4519_v55 = vpop.permute.xlu1 %2979 }
 0x242   : > { %v4489_v44 = vmax.f32 %v2783_v17, %v4481_v41  ;;  %v2784_v6 = vmax.f32 %v2776_v54, %v2780_v14 }
 0x244   : > { %v2787_v21 = vsub.f32 %v4429_v39, %v4489_v44  ;;  %v2795_v1 = vrot.slane %v4489_v44, 7  ;;  %v2805_v48 = vrot.slane %v4489_v44, 6  ;;  %v2815_v38 = vrot.slane %v4489_v44, 5 }
 0x245   : > { %v2825_v32 = vrot.slane %v4489_v44, 4  ;;  %v2835_v50 = vrot.slane %v4489_v44, 3  ;;  %v2845_v37 = vrot.slane %v4489_v44, 2  ;;  %v2855_v33 = vrot.slane %v4489_v44, 1 }
 0x246   : > { %v2789_v24 = vmul.f32 1.442695, %v2787_v21  ;;  %v2799_v4 = vsub.f32 %v4423_v31, %v2795_v1  ;;  %v2809_v43 = vsub.f32 %v4425_v59, %v2805_v48  ;;  %v2819_v39 = vsub.f32 %v4431_v11, %v2815_v38  ;;  %v4538_v1 = vpop.permute.xlu1 %3037  ;;  %v4540_v48 = vpop.permute.xlu0 %3006 }
 0x247   : > { %v2829_v22 = vsub.f32 %v4436_v18, %v2825_v32  ;;  %v2839_v35 = vsub.f32 %v4447_v20, %v2835_v50  ;;  %v2849_v31 = vsub.f32 %v4459_v45, %v2845_v37  ;;  %v2859_v59 = vsub.f32 %v2675_v47, %v2855_v33 }
 0x248   : > { %v2801_v0 = vmul.f32 1.442695, %v2799_v4  ;;  %v2811_v53 = vmul.f32 1.442695, %v2809_v43  ;;  %v2821_v5 = vmul.f32 1.442695, %v2819_v39  ;;  %3481 = vpow2.f32 %v2789_v24 }
 0x249   : > { %v2831_v11 = vmul.f32 1.442695, %v2829_v22  ;;  %v2841_v63 = vmul.f32 1.442695, %v2839_v35  ;;  %v2851_v18 = vmul.f32 1.442695, %v2849_v31  ;;  %v4517_v20 = vmax.f32 %v2784_v6, %v4514_v26 }
 0x24a   : > { %3483 = vpow2.f32 %v2801_v0  ;;  %v2861_v60 = vmul.f32 1.442695, %v2859_v59  ;;  %v4556_v4 = vpop.permute.xlu0 %3010 }
 0x24b   : > { %3485 = vpow2.f32 %v2811_v53  ;;  %v2788_v45 = vsub.f32 %v4453_v16, %v4517_v20  ;;  %v2796_v47 = vrot.slane %v4517_v20, 7  ;;  %v2806_v23 = vrot.slane %v4517_v20, 6 }
 0x24c   : > { %3487 = vpow2.f32 %v2821_v5  ;;  %v2816_v56 = vrot.slane %v4517_v20, 5  ;;  %v2826_v12 = vrot.slane %v4517_v20, 4  ;;  %v2836_v17 = vrot.slane %v4517_v20, 3 }
 0x24d   : > { %3489 = vpow2.f32 %v2831_v11  ;;  %v2791_v58 = vmul.f32 1.442695, %v2788_v45  ;;  %v2800_v40 = vsub.f32 %v4442_v2, %v2796_v47  ;;  %v2810_v62 = vsub.f32 %v4445_v49, %v2806_v23 }
 0x24e   : > { %3491 = vpow2.f32 %v2841_v63  ;;  %v2865_v16 = vsub.f32 %v4481_v41, %v4489_v44  ;;  %v2820_v29 = vsub.f32 %v4456_v9, %v2816_v56  ;;  %v2830_v13 = vsub.f32 %v4464_v42, %v2826_v12  ;;  %v4574_v6 = vpop.permute.xlu0 %3089 }
 0x24f   : > { %3493 = vpow2.f32 %v2851_v18  ;;  %v2803_v10 = vmul.f32 1.442695, %v2800_v40  ;;  %v2813_v28 = vmul.f32 1.442695, %v2810_v62  ;;  %v2840_v54 = vsub.f32 %v4471_v52, %v2836_v17 }
 0x250   : > { %3495 = vpow2.f32 %v2861_v60  ;;  %v2846_v21 = vrot.slane %v4517_v20, 2  ;;  %v2823_v2 = vmul.f32 1.442695, %v2820_v29  ;;  %v2833_v49 = vmul.f32 1.442695, %v2830_v13 }
 0x251   : > { %3497 = vpow2.f32 %v2791_v58  ;;  %v2856_v9 = vrot.slane %v4517_v20, 1  ;;  %v2867_v44 = vmul.f32 1.442695, %v2865_v16  ;;  %v2843_v52 = vmul.f32 1.442695, %v2840_v54 }
 0x252   : > { %3499 = vpow2.f32 %v2803_v10  ;;  %v2850_v41 = vsub.f32 %v4477_v36, %v2846_v21  ;;  %v4554_v36 = vpop.permute.xlu1 %3041  ;;  %v2866_v35 = vsub.f32 %v4514_v26, %v4517_v20  ;;  %v4592_v13 = vpop.permute.xlu0 %3151 }
 0x253   : > { %3501 = vpow2.f32 %v2813_v28  ;;  %v2860_v38 = vsub.f32 %v4492_v61, %v2856_v9 }
 0x254   : > { %3503 = vpow2.f32 %v2823_v2  ;;  %v2853_v33 = vmul.f32 1.442695, %v2850_v41  ;;  %v2869_v63 = vmul.f32 1.442695, %v2866_v35 }
 0x255   : > { %v4544_v42 = vpop.eup %3481  ;;  %3505 = vpow2.f32 %v2833_v49  ;;  %v2863_v61 = vmul.f32 1.442695, %v2860_v38 }
 0x256   : > { %3507 = vpow2.f32 %v2867_v44  ;;  %v4572_v11 = vpop.permute.xlu1 %3120 }
 0x257   : > { %v4547_v32 = vpop.eup %3483  ;;  %3509 = vpow2.f32 %v2843_v52 }
 0x258   : > { %v4549_v50 = vpop.eup %3485  ;;  %v2873_v37 = vrot.slane %v4547_v32, 1  ;;  %3511 = vpow2.f32 %v2853_v33 }
 0x259   : > { %v4552_v24 = vpop.eup %3487  ;;  %v2881_v39 = vrot.slane %v4549_v50, 2  ;;  %3513 = vpow2.f32 %v2863_v61 }
 0x25a   : > { %v2877_v43 = vadd.f32 %v4544_v42, %v2873_v37  ;;  %v4560_v22 = vpop.eup %3489  ;;  %v2889_v0 = vrot.slane %v4552_v24, 3  ;;  %3515 = vpow2.f32 %v2869_v63  ;;  %v2947_v29 = vpop.permute.xlu1 %2946 }
 0x25b   : > { %v4564_v30 = vpop.eup %3491  ;;  %v2897_v59 = vrot.slane %v4560_v22, 4 }
 0x25c   : > { %v2885_v14 = vadd.f32 %v2881_v39, %v2877_v43  ;;  %v4567_v53 = vpop.eup %3493  ;;  %v2905_v20 = vrot.slane %v4564_v30, 5  ;;  %v2978_v43 = vpop.permute.xlu0 %2977 }
 0x25d   : > { %v4569_v5 = vpop.eup %3495  ;;  %v2913_v23 = vrot.slane %v4567_v53, 6 }
 0x25e   : > { %v2893_v31 = vadd.f32 %v2889_v0, %v2885_v14  ;;  %v4576_v26 = vpop.eup %3497  ;;  %v2921_v58 = vrot.slane %v4569_v5, 7  ;;  %v4606_v33 = vpop.permute.xlu1 %3008 }
 0x25f   : > { %v4579_v60 = vpop.eup %3499 }
 0x260   : > { %v2901_v18 = vadd.f32 %v2897_v59, %v2893_v31  ;;  %v4581_v45 = vpop.eup %3501  ;;  %v2874_v56 = vrot.slane %v4579_v60, 1  ;;  %v4614_v63 = vpop.permute.xlu0 %3039 }
 0x261   : > { %v4585_v12 = vpop.eup %3503  ;;  %v2882_v62 = vrot.slane %v4581_v45, 2 }
 0x262   : > { %v2909_v47 = vadd.f32 %v2905_v20, %v2901_v18  ;;  %v2878_v40 = vadd.f32 %v4576_v26, %v2874_v56  ;;  %v4590_v16 = vpop.eup %3505  ;;  %v2890_v21 = vrot.slane %v4585_v12, 3  ;;  %v4612_v59 = vpop.permute.xlu1 %3178  ;;  %v2494_v20 = vld [vmem:[#allocation3 + $0x4] sm:$0xff] }
 0x263   : > { %v4594_v10 = vpop.eup %3507  ;;  %v2898_v9 = vrot.slane %v4590_v16, 4 }
 0x264   : > { %v2917_v17 = vadd.f32 %v2913_v23, %v2909_v47  ;;  %v2886_v54 = vadd.f32 %v2882_v62, %v2878_v40  ;;  %v4597_v2 = vpop.eup %3509  ;;  %v4619_v56 = vpop.permute.xlu0 %3155 }
 0x265   : > { %v4601_v44 = vpop.eup %3511  ;;  %v2906_v38 = vrot.slane %v4597_v2, 5 }
 0x266   : > { %v2925_v28 = vadd.f32 %v2921_v58, %v2917_v17  ;;  %v2894_v41 = vadd.f32 %v2890_v21, %v2886_v54  ;;  %v4604_v37 = vpop.eup %3513  ;;  %v2914_v61 = vrot.slane %v4601_v44, 6  ;;  %v4617_v23 = vpop.permute.xlu1 %3091  ;;  %v4622_v17 = vmul.f32 %v2494_v20, %v4329_v34 }
 0x267   : > { %v2922_v14 = vrot.slane %v4604_v37, 7  ;;  %v4610_v0 = vpop.eup %3515  ;;  %v2950_v34 = vsel %vm2295_vm9, %v4508_v51, %v2947_v29 }
 0x268   : > { %v2927_v49 = vadd.f32 %v4594_v10, %v2925_v28  ;;  %v2902_v52 = vadd.f32 %v2898_v9, %v2894_v41 }
 0x26a   : > { %3517 = vrcp.f32 %v2927_v49  ;;  %v2910_v39 = vadd.f32 %v2906_v38, %v2902_v52 }
 0x26c   : > { %v2918_v35 = vadd.f32 %v2914_v61, %v2910_v39  ;;  %v3066_v61 = vcombine.high %v4622_v17, %v4622_v17 }
 0x26e   : > { %v2926_v31 = vadd.f32 %v2922_v14, %v2918_v35  ;;  %v2981_v35 = vsel %vm2349_vm8, %v4506_v15, %v2978_v43  ;;  %v2951_v15 = vsel %vm2295_vm9, %v2947_v29, %v4521_v46 }
 0x270   : > { %v2928_v18 = vadd.f32 %v4610_v0, %v2926_v31 }
 0x272   : > { %3519 = vrcp.f32 %v2928_v18 }
 0x277   : > { %v3518_v47 = vpop.eup %3517 }
 0x278   : > { %v2931_v58 = vmul.f32 %v3518_v47, %v4544_v42  ;;  %v2958_v40 = vrot.slane %v3518_v47, 7  ;;  %v2989_v62 = vrot.slane %v3518_v47, 6  ;;  %v3020_v28 = vrot.slane %v3518_v47, 5 }
 0x279   : > { %v3051_v54 = vrot.slane %v3518_v47, 4  ;;  %v3072_v21 = vrot.slane %v3518_v47, 3  ;;  %v3103_v49 = vrot.slane %v3518_v47, 2  ;;  %v3134_v41 = vrot.slane %v3518_v47, 1 }
 0x27a   : > { %v2936_v9 = vrot.slane %v2931_v58, %v3954_v27  ;;  %v2962_v52 = vmul.f32 %v4547_v32, %v2958_v40  ;;  %v2993_v38 = vmul.f32 %v4549_v50, %v2989_v62  ;;  %v3024_v39 = vmul.f32 %v4552_v24, %v3020_v28  ;;  %v4639_v50 = vpop.permute.xlu1 %3153  ;;  %v4641_v24 = vpop.permute.xlu0 %3122 }
 0x27b   : > { %v3055_v42 = vmul.f32 %v4560_v22, %v3051_v54  ;;  %v3076_v32 = vmul.f32 %v4564_v30, %v3072_v21  ;;  %v3107_v18 = vmul.f32 %v4567_v53, %v3103_v49  ;;  %v3138_v20 = vmul.f32 %v4569_v5, %v3134_v41  ;;  %v4816_v21 = vld [vmem:[#allocation21_spill] sm:$0xff]  ;;  %v4817_v49 = vld [vmem:[#allocation20_spill] sm:$0xff] }
 0x27c   : > { %v2967_v14 = vrot.slane %v2962_v52, %v3920_v7  ;;  %v2998_v31 = vrot.slane %v2993_v38, %v3915_v3  ;;  %v3029_v51 = vrot.slane %v3024_v39, %v3939_v19  ;;  %v3012_v58 = vsel %vm2403_vm2, %v4540_v48, %v4606_v33 }
 0x27d   : > { %v3060_v22 = vrot.slane %v3055_v42, %v4323_v25  ;;  %v2954_v30 = vmul.f32 %v2950_v34, %v2936_v9  ;;  %v2982_v62 = vsel %vm2349_vm8, %v2978_v43, %v4519_v55  ;;  %v3043_v28 = vsel %vm2457_vm3, %v4538_v1, %v4614_v63  ;;  %v4818_v9 = vld [vmem:[#allocation22_spill] sm:$0xff] }
 0x27e   : > { %v2985_v40 = vmul.f32 %v2981_v35, %v2967_v14  ;;  %v3095_v53 = vsel %vm2440_vm7, %v4574_v6, %v4617_v23  ;;  %v3157_v46 = vsel %vm2332_vm4, %v4592_v13, %v4639_v50  ;;  %v3126_v48 = vsel %vm2386_vm6, %v4572_v11, %v4641_v24 }
 0x27f   : > { %v3068_v5 = vmul.f32 %v3060_v22, %v4622_v17  ;;  %v3016_v55 = vmul.f32 %v3012_v58, %v2998_v31  ;;  %v3520_v43 = vpop.eup %3519  ;;  %v3047_v54 = vmul.f32 %v3043_v28, %v3029_v51  ;;  %v3081_v1 = vrot.slane %v3076_v32, %v4816_v21  ;;  %v3181_v28 = vpop.permute.xlu0 %3180 }
 0x280   : > { %v2987_v29 = vadd.f32 %v2985_v40, %v2954_v30  ;;  %v3112_v41 = vrot.slane %v3107_v18, %v4817_v49  ;;  %v3143_v6 = vrot.slane %v3138_v20, %v4818_v9  ;;  %v2932_v17 = vmul.f32 %v3520_v43, %v4576_v26 }
 0x281   : > { %v2959_v52 = vrot.slane %v3520_v43, 7  ;;  %v2990_v38 = vrot.slane %v3520_v43, 6  ;;  %v3021_v13 = vrot.slane %v3520_v43, 5  ;;  %v3052_v34 = vrot.slane %v3520_v43, 4 }
 0x282   : > { %v3018_v39 = vadd.f32 %v3016_v55, %v2987_v29  ;;  %v3073_v42 = vrot.slane %v3520_v43, 3  ;;  %v3165_v11 = vmul.f32 %v3518_v47, %v4594_v10  ;;  %v2940_v35 = vrot.slane %v2932_v17, %v3954_v27 }
 0x283   : > { %v2963_v14 = vmul.f32 %v4579_v60, %v2959_v52  ;;  %v2994_v31 = vmul.f32 %v4581_v45, %v2990_v38  ;;  %v3025_v51 = vmul.f32 %v4585_v12, %v3021_v13  ;;  %v3056_v22 = vmul.f32 %v4590_v16, %v3052_v34 }
 0x284   : > { %v3049_v32 = vadd.f32 %v3047_v54, %v3018_v39  ;;  %v3099_v26 = vmul.f32 %v3095_v53, %v3081_v1  ;;  %v3130_v18 = vmul.f32 %v3126_v48, %v3112_v41  ;;  %v3104_v40 = vrot.slane %v3520_v43, 2 }
 0x285   : > { %v2971_v20 = vrot.slane %v2963_v14, %v3920_v7  ;;  %v3002_v58 = vrot.slane %v2994_v31, %v3915_v3  ;;  %v3033_v10 = vrot.slane %v3025_v51, %v3939_v19  ;;  %v3064_v47 = vrot.slane %v3056_v22, %v4323_v25 }
 0x286   : > { %v3070_v30 = vadd.f32 %v3068_v5, %v3049_v32  ;;  %v3077_v60 = vmul.f32 %v4597_v2, %v3073_v42  ;;  %v3170_v45 = vrot.slane %v3165_v11, %v3954_v27  ;;  %v2955_v12 = vmul.f32 %v2951_v15, %v2940_v35 }
 0x287   : > { %v2986_v29 = vmul.f32 %v2982_v62, %v2971_v20  ;;  %v3135_v53 = vrot.slane %v3520_v43, 1  ;;  %v3013_v3 = vsel %vm2403_vm2, %v4606_v33, %v4556_v4  ;;  %v3044_v7 = vsel %vm2457_vm3, %v4614_v63, %v4554_v36 }
 0x288   : > { %v3101_v16 = vadd.f32 %v3099_v26, %v3070_v30  ;;  %v3069_v19 = vmul.f32 %v3066_v61, %v3064_v47  ;;  %v3161_v25 = vmul.f32 %v3157_v46, %v3143_v6  ;;  %v3017_v2 = vmul.f32 %v3013_v3, %v3002_v58 }
 0x289   : > { %v2988_v5 = vadd.f32 %v2986_v29, %v2955_v12  ;;  %v3108_v48 = vmul.f32 %v4601_v44, %v3104_v40  ;;  %v3184_v62 = vsel %vm2276_vm5, %v4612_v59, %v3181_v28  ;;  %v3048_v55 = vmul.f32 %v3044_v7, %v3033_v10 }
 0x28a   : > { %v3132_v15 = vadd.f32 %v3130_v18, %v3101_v16  ;;  %v3085_v54 = vrot.slane %v3077_v60, %v4816_v21  ;;  %v3139_v33 = vmul.f32 %v4604_v37, %v3135_v53  ;;  %v3188_v63 = vmul.f32 %v3184_v62, %v3170_v45 }
 0x28b   : > { %v3019_v4 = vadd.f32 %v3017_v2, %v2988_v5  ;;  %v3116_v46 = vrot.slane %v3108_v48, %v4817_v49  ;;  %v3166_v44 = vmul.f32 %v3520_v43, %v4610_v0  ;;  %v3096_v59 = vsel %vm2440_vm7, %v4617_v23, %v4485_v8  ;;  %v3183_v49 = vpop.permute.xlu1 %3182 }
 0x28c   : > { %v3163_v36 = vadd.f32 %v3161_v25, %v3132_v15  ;;  %v3100_v41 = vmul.f32 %v3096_v59, %v3085_v54  ;;  %v3147_v6 = vrot.slane %v3139_v33, %v4818_v9  ;;  %v3127_v37 = vsel %vm2386_vm6, %v4641_v24, %v4483_v57 }
 0x28d   : > { %v3050_v61 = vadd.f32 %v3048_v55, %v3019_v4  ;;  %v3131_v0 = vmul.f32 %v3127_v37, %v3116_v46  ;;  %v3174_v43 = vrot.slane %v3166_v44, %v3954_v27  ;;  %v3158_v8 = vsel %vm2332_vm4, %v4639_v50, %v4619_v56 }
 0x28e   : > { %v3190_v1 = vadd.f32 %v3188_v63, %v3163_v36  ;;  %v3162_v52 = vmul.f32 %v3158_v8, %v3147_v6  ;;  %v3185_v9 = vsel %vm2276_vm5, %v3181_v28, %v3183_v49 }
 0x28f   : > { %v3071_v21 = vadd.f32 %v3069_v19, %v3050_v61  ;;  %v3189_v57 = vmul.f32 %v3185_v9, %v3174_v43 }
 0x291   : > { %v3102_v17 = vadd.f32 %v3100_v41, %v3071_v21 }
 0x293   : > { %v3133_v23 = vadd.f32 %v3131_v0, %v3102_v17 }
 0x295   : > { %v3164_v38 = vadd.f32 %v3162_v52, %v3133_v23 }
 0x297   : > { %v3191_v24 = vadd.f32 %v3189_v57, %v3164_v38 }
 0x299   : > { %v3194_v39 = vcombine.low %v3190_v1, %v3191_v24 }
 0x29b   : > { %3196 = vst [vmem:[%s275_s22] sm:$0xff] %v3194_v39 }
 0x29c   : > { %3588 = shalt.err (!%p3585_p8)
}
 0x29d   : > { %s3589_s15 = scalar_lea.hbm %s3214_s26, 128  ;;  %s3593_s12 = scalar_lea.hbm %s4820_s14, 512 }
 0x29e   : > { %p3590_p9 = scmp.ne.s32.totalorder %s3214_s26, %s3589_s15  ;;  %p3594_p4 = scmp.lt.s32.totalorder %s3214_s26, %s4820_s14 }
 0x29f   : > { %p3595_p6 = scmp.lt.s32.totalorder %s3593_s12, %s3589_s15 }
 0x2a0   : > { %p3591_p11 = pnand %p3590_p9, %p4821_p10 }
 0x2a1   : > { %p3596_p7 = por %p3595_p6, %p3594_p4 }
 0x2a2   : > { %p3592_p13 = pneg %p3591_p11 }
 0x2a4   : > { %p3597_p3 = pnand %p3596_p7, %p3592_p13 }
 0x2a6   : > { %3600 = shalt.err (!%p3597_p3)
}
 0x2a7   : > { %3359 = dma.vmem_to_hbm [thread:$0]  (%p4821_p10), %s3217_s8, 128, %s3214_s26, %s3198_s28  }
 0x2a8 PF: > { %s4822_s25 = sld [smem:[#allocation15_spill]] }
 0x2a9   : > { %s4823_s6 = sld [smem:[#allocation13_spill]] }
 0x2aa   : > { %s4824_s21 = sld [smem:[#allocation17_spill]] }
 0x2ae   : > { %p3376_p12 = scmp.ge.s32.totalorder %s4822_s25, 2 }
 0x2af   : > { %s3228_s22 = sand.u32 1, %s4823_s6  }
 0x2b0   : > { %p4825_p0 = scmp.ne.s32.totalorder %s4824_s21, 0  ;;  %s3229_s9 = scalar_lea.sflag [#allocation6], %s3228_s22 }
 0x2b2   : > { %p3370_p1 = pnand %p3376_p12, %p4825_p0 }
 0x2b4   : > { %p3371_p2 = pneg %p3370_p1 }
 0x2b6   : > { %3654 = dma.done.wait (%p3371_p2), %s3229_s9, 128  }
 0x2b7   : > { %3656 = vsyncadd (%p3371_p2), %s3229_s9, 4294967168  ;;  %s21_s25 = sadd.s32 1, %s4822_s25   ;;  %s4826_s29 = smov %s3872_s18 }
 0x2b8   : > { %p18_p5 = scmp.ge.s32.totalorder %s21_s25, 6   ;;  %s4827_s21 = sld [smem:[#allocation14_spill]] }
 0x2b9   : > { %s4828_s23 = sld [smem:[#allocation18_spill]]  ;;  %s4830_s15 = smov %s3663_s16 }
 0x2ba   : > { %s4829_s8 = sld [smem:[#allocation19_spill]]  ;;  %s4831_s16 = smov %s3667_s17 }
 0x2bb   : > { %s4832_s17 = smov %s3882_s7  ;;  %s4833_s18 = smov %s3675_s19 }
 0x2bc   : > { %s4834_s19 = smov %s3679_s20  ;;  %s4835_s20 = smov %s4826_s29 }
 0x2bd   : > { %s4836_s22 = smov %s3695_s24  ;;  %20 = sbr.rel (!%p18_p5) target bundleno = 13 (0xd), region = 95 }
 0x2c0   : > { %s4837_s24 = smov %s4829_s8 }
 0x2c2   :  { %3234 = vsyncpa [#allocation5], 1 }
 0x2c3   :  { %3236 = vsyncpa [#allocation5 + $0x1], 1 }
 0x2c4   :  { %3237 = vsyncpa [#allocation8], 1 }
 0x2c5   :  { %3238 = vsyncpa [#allocation6], 1 }
 0x2c6   :  { %3240 = vsyncpa [#allocation6 + $0x1], 1 }

</bundles_post_ra>
